<compile_context>
chip_gen: v5e
topology: v5e:2x2
jax: 0.10.0
libtpu: 0.0.40
codegen_flags: <defaults>
</compile_context>

<pallas_src>
import jax
import jax.numpy as jnp
from jax import lax
from jax.experimental import pallas as pl
from jax.experimental.pallas import tpu as pltpu

# ----------------------------- problem sizes -------------------------------
N, C, T, V = 2, 4, 16, 8            # batch, in_channels, time, graph nodes
K = 3                               # spatial kernel size (A.shape[0])
COUT = 8                            # rt_gcn out channels
KT = 9                              # temporal kernel size
PAD = (KT - 1) // 2                 # = 4
STRIDE = 2
T_OUT = (T + 2 * PAD - KT) // STRIDE + 1    # = 8
TV = T * V                          # 128 lanes per sample
TOV = T_OUT * V                     # 64 lanes per sample after stride-2 conv


# ------------------------------ Pallas kernel ------------------------------
def rtgcn_kernel(x_ref, ak_ref, bsc_ref, bpool_ref, bn0s_ref, bn0b_ref,
                 wg_ref, bg_ref, bn1s_ref, bn1b_ref,
                 wt_ref, wr_ref, bz_ref, wf_ref, bf_ref,
                 out_ref, ic_ref):
    f32 = jnp.float32
    bf16 = jnp.bfloat16
    HI = lax.Precision.HIGHEST   # only on the tiny learned-weight matmuls

    # ---- data_bn (inference affine per (c, v), tiled over t on the host) ---
    x = x_ref[0] * bn0s_ref[...] + bn0b_ref[...]                       # (C, TV)

    # ---- gcn 1x1 conv (+bias): K tiny HIGHEST dots, lane-concatenated ------
    y_wide = jnp.concatenate(
        [jnp.dot(wg_ref[k * COUT:(k + 1) * COUT, :], x,
                 preferred_element_type=f32, precision=HI)
         + bg_ref[k * COUT:(k + 1) * COUT, :]
         for k in range(K)], axis=1)                                    # (COUT, K*TV)

    # ---- graph contraction: one matmul vs. block-diag adjacency operator.
    # Default MXU precision (perf review): A is row-normalised, bounded by the
    # accepted 1e-2 tolerance.
    h = jnp.dot(y_wide, ak_ref[...], preferred_element_type=f32)        # (COUT, TV)

    # ---- tcn BN1 + ReLU (plain per-channel scale/shift) --------------------
    h = jnp.maximum(h * bn1s_ref[...] + bn1b_ref[...], 0.0)

    # ---- temporal conv (9,1)/stride(2,1)/pad(4,0): exact 0/1 selection -----
    # operator stored in bf16 (exact), native bf16 MXU pass; im2col restack
    # into a no-pad (72, 64) scratch; one weight matmul + tiny residual dot.
    shifted = jnp.dot(h.astype(bf16), bsc_ref[...],
                      preferred_element_type=f32)                       # (COUT, KT*TOV)
    x_even = jnp.dot(x.astype(bf16), bsc_ref[:, PAD * TOV:(PAD + 1) * TOV],
                     preferred_element_type=f32)                        # (C, TOV)
    for tau in range(KT):
        ic_ref[tau * COUT:(tau + 1) * COUT, :] = shifted[:, tau * TOV:(tau + 1) * TOV]
    z = (jnp.dot(wt_ref[...], ic_ref[...], preferred_element_type=f32,
                 precision=HI)
         + jnp.dot(wr_ref[...], x_even, preferred_element_type=f32,
                   precision=HI)
         + bz_ref[...])                                                 # (COUT, TOV)

    # ---- LeakyReLU(0.2) -> avg-pool over T_out -> fcn 1x1 conv -------------
    z = jnp.where(z >= 0.0, z, 0.2 * z)
    pooled = jnp.dot(z.astype(bf16), bpool_ref[...],
                     preferred_element_type=f32)                        # (COUT, V)
    out_ref[0] = (jnp.dot(wf_ref[...], pooled, preferred_element_type=f32,
                          precision=HI) + bf_ref[...])                  # (1, V)


def _const_spec(shape):
    nd = len(shape)
    return pl.BlockSpec(shape, lambda n, _nd=nd: (0,) * _nd)


# ---------------- constant operators: built ONCE and cached -----------------
def build_operators(A, p):
    """Everything that depends only on (A, params); call once and reuse."""
    f32 = jnp.float32
    bf16 = jnp.bfloat16
    eyeV = jnp.eye(V, dtype=f32)
    eyeT = jnp.eye(T, dtype=f32)

    # per-sample graph operator: [kron(I_T, A_0); kron(I_T, A_1); kron(I_T, A_2)]
    akron_tall = jnp.concatenate([jnp.kron(eyeT, A[k]) for k in range(K)],
                                 axis=0)                                 # (K*TV, TV) f32

    # temporal shift taps (stride 2, pad 4), concatenated over tau on lanes
    s_idx = jnp.arange(T_OUT)[:, None]
    t_idx = jnp.arange(T)[None, :]
    taps = [(t_idx == (2 * s_idx + tau - PAD)).astype(f32) for tau in range(KT)]
    bshift_cat = jnp.concatenate([jnp.kron(m.T, eyeV) for m in taps],
                                 axis=1).astype(bf16)                    # (TV, KT*TOV)

    # average pool over T_OUT (1/8 exact in bf16)
    bpool = jnp.kron(jnp.ones((T_OUT, 1), f32) / T_OUT, eyeV).astype(bf16)  # (TOV, V)

    # data_bn folded per (c, v); BatchNorm1d feature index = v*C + c
    scale_cv = p['dbn_s'].reshape(V, C).T
    shift_cv = p['dbn_b'].reshape(V, C).T
    bn0s = jnp.tile(scale_cv, (1, T))                                    # (C, TV)
    bn0b = jnp.tile(shift_cv, (1, T))

    # temporal conv weights scaled by BN2, im2col row order (tau, in_channel)
    wt_k = jnp.transpose(p['wt_full'][..., 0], (2, 0, 1))                # (KT, O, I)
    wt_sc = p['bn2_s'][None, :, None] * wt_k
    wt_row = jnp.transpose(wt_sc, (1, 0, 2)).reshape(COUT, KT * COUT)    # (COUT, 72)
    wr_sc = p['bnr_s'][:, None] * p['wr']                                # (COUT, C)
    bias_z = (p['bn2_s'] * p['bt'] + p['bn2_b']
              + p['bnr_s'] * p['br'] + p['bnr_b'])[:, None]              # (COUT, 1)

    return dict(
        akron=akron_tall, bshift=bshift_cat, bpool=bpool,
        bn0s=bn0s, bn0b=bn0b,
        wg=p['wg'], bg=p['bg'][:, None],
        bn1s=p['bn1_s'][:, None], bn1b=p['bn1_b'][:, None],
        wt=wt_row, wr=wr_sc, bz=bias_z,
        wf=p['wf'], bf=p['bf'][:, None])


@jax.jit
def model_forward_pallas(x, ops):
    """x: (N, C, T, V) float32; ops: cached dict from build_operators."""
    xf = x.reshape(N, C, TV)    # lanes = t*V + v, no transpose needed

    grid_spec = pltpu.PrefetchScalarGridSpec(
        num_scalar_prefetch=0,
        grid=(N,),                                  # one step per batch element
        in_specs=[
            pl.BlockSpec((1, C, TV), lambda n: (n, 0, 0)),   # x (per sample)
            _const_spec((K * TV, TV)),              # akron_tall (resident)
            _const_spec((TV, KT * TOV)),            # bshift_cat (bf16, resident)
            _const_spec((TOV, V)),                  # bpool (bf16)
            _const_spec((C, TV)), _const_spec((C, TV)),      # data_bn scale/shift
            _const_spec((K * COUT, C)),             # gcn weights
            _const_spec((K * COUT, 1)),             # gcn bias
            _const_spec((COUT, 1)), _const_spec((COUT, 1)),  # BN1 scale/shift
            _const_spec((COUT, KT * COUT)),         # temporal weights (BN2-folded)
            _const_spec((COUT, C)),                 # residual weights (BNr-folded)
            _const_spec((COUT, 1)),                 # fused bias
            _const_spec((1, COUT)), _const_spec((1, 1)),     # fcn
        ],
        out_specs=pl.BlockSpec((1, 1, V), lambda n: (n, 0, 0)),
        scratch_shapes=[
            pltpu.VMEM((KT * COUT, TOV), jnp.float32),       # temporal im2col
        ],
    )

    out = pl.pallas_call(
        rtgcn_kernel,
        out_shape=jax.ShapeDtypeStruct((N, 1, V), jnp.float32),
        grid_spec=grid_spec,
        compiler_params=pltpu.CompilerParams(dimension_semantics=("parallel",)),
    )(xf, ops['akron'], ops['bshift'], ops['bpool'], ops['bn0s'], ops['bn0b'],
      ops['wg'], ops['bg'], ops['bn1s'], ops['bn1b'],
      ops['wt'], ops['wr'], ops['bz'], ops['wf'], ops['bf'])
    return out.reshape(N, V)


# ------------------------- pure-JAX reference (NCHW) ------------------------
def reference_forward(x, A, p):
    HI = lax.Precision.HIGHEST
    xb = jnp.transpose(x, (0, 3, 1, 2)).reshape(N, V * C, T)
    xb = xb * p['dbn_s'][None, :, None] + p['dbn_b'][None, :, None]
    xb = xb.reshape(N, V, C, T).transpose(0, 2, 3, 1)                 # (N, C, T, V)

    res = lax.conv_general_dilated(xb, p['wr'][:, :, None, None], (2, 1),
                                   ((0, 0), (0, 0)),
                                   dimension_numbers=('NCHW', 'OIHW', 'NCHW'),
                                   precision=HI)
    res = res + p['br'][None, :, None, None]
    res = res * p['bnr_s'][None, :, None, None] + p['bnr_b'][None, :, None, None]

    y = jnp.einsum('oc,nctv->notv', p['wg'], xb, precision=HI) + p['bg'][None, :, None, None]
    y = y.reshape(N, K, COUT, T, V)
    h = jnp.einsum('nkctv,kvw->nctw', y, A, precision=HI)

    h = jnp.maximum(h * p['bn1_s'][None, :, None, None] + p['bn1_b'][None, :, None, None], 0.0)
    t = lax.conv_general_dilated(h, p['wt_full'], (2, 1), ((PAD, PAD), (0, 0)),
                                 dimension_numbers=('NCHW', 'OIHW', 'NCHW'),
                                 precision=HI)
    t = t + p['bt'][None, :, None, None]
    t = t * p['bn2_s'][None, :, None, None] + p['bn2_b'][None, :, None, None]

    z = t + res
    z = jnp.where(z >= 0.0, z, 0.2 * z)
    pooled = jnp.mean(z, axis=2, keepdims=True)
    out = jnp.einsum('oc,ncsv->nosv', p['wf'], pooled, precision=HI) + p['bf'][None, :, None, None]
    return out.reshape(N, V)


# ----------------------------- parameter setup ------------------------------
def bn_fold(gamma, beta, rmean, rvar, eps=1e-5):
    s = gamma / jnp.sqrt(rvar + eps)
    return s, beta - rmean * s


def make_params(key):
    ks = jax.random.split(key, 24)
    nrm = lambda i, shp, sc=0.3: sc * jax.random.normal(ks[i], shp, dtype=jnp.float32)

    def bn_params(i, nfeat):
        g = 1.0 + 0.1 * jax.random.normal(ks[i], (nfeat,), dtype=jnp.float32)
        b = 0.1 * jax.random.normal(jax.random.fold_in(ks[i], 1), (nfeat,), dtype=jnp.float32)
        rm = 0.1 * jax.random.normal(jax.random.fold_in(ks[i], 2), (nfeat,), dtype=jnp.float32)
        rv = jax.random.uniform(jax.random.fold_in(ks[i], 3), (nfeat,),
                                dtype=jnp.float32, minval=0.5, maxval=1.5)
        return bn_fold(g, b, rm, rv)

    p = {}
    p['dbn_s'], p['dbn_b'] = bn_params(0, C * V)             # data_bn (BatchNorm1d)
    p['wg'] = nrm(1, (K * COUT, C))                          # gcn 1x1 conv
    p['bg'] = nrm(2, (K * COUT,), 0.1)
    p['bn1_s'], p['bn1_b'] = bn_params(3, COUT)              # tcn BN #1
    p['wt_full'] = nrm(4, (COUT, COUT, KT, 1), 0.15)         # temporal conv (OIHW)
    p['bt'] = nrm(5, (COUT,), 0.1)
    p['bn2_s'], p['bn2_b'] = bn_params(6, COUT)              # tcn BN #2
    p['wr'] = nrm(7, (COUT, C))                              # residual 1x1 conv
    p['br'] = nrm(8, (COUT,), 0.1)
    p['bnr_s'], p['bnr_b'] = bn_params(9, COUT)              # residual BN
    p['wf'] = nrm(10, (1, COUT))                             # fcn 1x1 conv
    p['bf'] = nrm(11, (1,), 0.1)
    return p


if __name__ == "__main__":
    key = jax.random.PRNGKey(0)
    kx, ka, kp = jax.random.split(key, 3)

    x = jax.random.normal(kx, (N, C, T, V), dtype=jnp.float32)
    # synthetic (K, V, V) adjacency stack (Graph class not provided); row-normalized
    A_raw = jnp.abs(jax.random.normal(ka, (K, V, V), dtype=jnp.float32))
    A = A_raw / jnp.sum(A_raw, axis=-1, keepdims=True)

    params = make_params(kp)

    # Constant operators depend only on (A, params): build once, reuse per call.
    ops = jax.block_until_ready(build_operators(A, params))

    out = jax.block_until_ready(model_forward_pallas(x, ops))
    ref = jax.block_until_ready(reference_forward(x, A, params))

    assert out.shape == (N, V), out.shape
    # 1e-2 abs tolerance covers the bf16-class MXU passes (selection / pooling
    # operators and the default-precision adjacency contraction) vs. the
    # HIGHEST-precision f32 reference.
    assert jnp.allclose(out, ref, rtol=1e-3, atol=1e-2), \
        f"max abs diff {jnp.max(jnp.abs(out - ref))}"

    print("KERNEL_OK")
</pallas_src>

<mosaic_0001>
module attributes {stable_mosaic.version = 11 : i64} {
  func.func @rtgcn_kernel(%arg0: i32, %arg1: memref<1x4x128xf32, #tpu.memory_space<vmem>>, %arg2: memref<384x128xf32, #tpu.memory_space<vmem>>, %arg3: memref<128x576xbf16, #tpu.memory_space<vmem>>, %arg4: memref<64x8xbf16, #tpu.memory_space<vmem>>, %arg5: memref<4x128xf32, #tpu.memory_space<vmem>>, %arg6: memref<4x128xf32, #tpu.memory_space<vmem>>, %arg7: memref<24x4xf32, #tpu.memory_space<vmem>>, %arg8: memref<24x1xf32, #tpu.memory_space<vmem>>, %arg9: memref<8x1xf32, #tpu.memory_space<vmem>>, %arg10: memref<8x1xf32, #tpu.memory_space<vmem>>, %arg11: memref<8x72xf32, #tpu.memory_space<vmem>>, %arg12: memref<8x4xf32, #tpu.memory_space<vmem>>, %arg13: memref<8x1xf32, #tpu.memory_space<vmem>>, %arg14: memref<1x8xf32, #tpu.memory_space<vmem>>, %arg15: memref<1x1xf32, #tpu.memory_space<vmem>>, %arg16: memref<1x1x8xf32, #tpu.memory_space<vmem>>, %arg17: memref<72x64xf32, #tpu.memory_space<vmem>>) attributes {dimension_semantics = [#tpu.dimension_semantics<parallel>], iteration_bounds = array<i64: 2>, scalar_prefetch = 0 : i64, scratch_operands = 1 : i64, tpu.core_type = #tpu.core_type<tc>, window_params = [{transform_indices = @transform_0, window_bounds = array<i64: 1, 4, 128>}, {pipeline_mode = #tpu.pipeline_mode<synchronous>, transform_indices = @transform_1, window_bounds = array<i64: 384, 128>}, {pipeline_mode = #tpu.pipeline_mode<synchronous>, transform_indices = @transform_2, window_bounds = array<i64: 128, 576>}, {pipeline_mode = #tpu.pipeline_mode<synchronous>, transform_indices = @transform_3, window_bounds = array<i64: 64, 8>}, {pipeline_mode = #tpu.pipeline_mode<synchronous>, transform_indices = @transform_4, window_bounds = array<i64: 4, 128>}, {pipeline_mode = #tpu.pipeline_mode<synchronous>, transform_indices = @transform_5, window_bounds = array<i64: 4, 128>}, {pipeline_mode = #tpu.pipeline_mode<synchronous>, transform_indices = @transform_6, window_bounds = array<i64: 24, 4>}, {pipeline_mode = #tpu.pipeline_mode<synchronous>, transform_indices = @transform_7, window_bounds = array<i64: 24, 1>}, {pipeline_mode = #tpu.pipeline_mode<synchronous>, transform_indices = @transform_8, window_bounds = array<i64: 8, 1>}, {pipeline_mode = #tpu.pipeline_mode<synchronous>, transform_indices = @transform_9, window_bounds = array<i64: 8, 1>}, {pipeline_mode = #tpu.pipeline_mode<synchronous>, transform_indices = @transform_10, window_bounds = array<i64: 8, 72>}, {pipeline_mode = #tpu.pipeline_mode<synchronous>, transform_indices = @transform_11, window_bounds = array<i64: 8, 4>}, {pipeline_mode = #tpu.pipeline_mode<synchronous>, transform_indices = @transform_12, window_bounds = array<i64: 8, 1>}, {pipeline_mode = #tpu.pipeline_mode<synchronous>, transform_indices = @transform_13, window_bounds = array<i64: 1, 8>}, {pipeline_mode = #tpu.pipeline_mode<synchronous>, transform_indices = @transform_14, window_bounds = array<i64: 1, 1>}, {transform_indices = @transform_15, window_bounds = array<i64: 1, 1, 8>}]} {
    %c0 = arith.constant 0 : index
    %c0_0 = arith.constant 0 : index
    %c0_1 = arith.constant 0 : index
    %0 = vector.load %arg1[%c0, %c0_0, %c0_1] : memref<1x4x128xf32, #tpu.memory_space<vmem>>, vector<1x4x128xf32>
    %1 = vector.shape_cast %0 : vector<1x4x128xf32> to vector<4x128xf32>
    %c0_2 = arith.constant 0 : index
    %c0_3 = arith.constant 0 : index
    %2 = vector.load %arg5[%c0_2, %c0_3] : memref<4x128xf32, #tpu.memory_space<vmem>>, vector<4x128xf32>
    %3 = arith.mulf %1, %2 : vector<4x128xf32>
    %c0_4 = arith.constant 0 : index
    %c0_5 = arith.constant 0 : index
    %4 = vector.load %arg6[%c0_4, %c0_5] : memref<4x128xf32, #tpu.memory_space<vmem>>, vector<4x128xf32>
    %5 = arith.addf %3, %4 : vector<4x128xf32>
    %c0_6 = arith.constant 0 : index
    %c0_7 = arith.constant 0 : index
    %6 = vector.load %arg7[%c0_6, %c0_7] : memref<24x4xf32, #tpu.memory_space<vmem>>, vector<8x4xf32>
    %cst = arith.constant dense<0.000000e+00> : vector<8x128xf32>
    %7 = tpu.matmul %6, %5, %cst {dimension_numbers = #tpu.dot_dimension_numbers<[1], [0], [0], [1], [0, 0, 1, 1], [], []>, precision = #tpu.contract_precision<fp32>} : vector<8x4xf32>, vector<4x128xf32>, vector<8x128xf32> -> vector<8x128xf32>
    %c0_8 = arith.constant 0 : index
    %c0_9 = arith.constant 0 : index
    %8 = vector.load %arg8[%c0_8, %c0_9] : memref<24x1xf32, #tpu.memory_space<vmem>>, vector<8x1xf32>
    %9 = vector.broadcast %8 : vector<8x1xf32> to vector<8x128xf32>
    %10 = arith.addf %7, %9 : vector<8x128xf32>
    %c8 = arith.constant 8 : index
    %c0_10 = arith.constant 0 : index
    %11 = vector.load %arg7[%c8, %c0_10] : memref<24x4xf32, #tpu.memory_space<vmem>>, vector<8x4xf32>
    %cst_11 = arith.constant dense<0.000000e+00> : vector<8x128xf32>
    %12 = tpu.matmul %11, %5, %cst_11 {dimension_numbers = #tpu.dot_dimension_numbers<[1], [0], [0], [1], [0, 0, 1, 1], [], []>, precision = #tpu.contract_precision<fp32>} : vector<8x4xf32>, vector<4x128xf32>, vector<8x128xf32> -> vector<8x128xf32>
    %c8_12 = arith.constant 8 : index
    %c0_13 = arith.constant 0 : index
    %13 = vector.load %arg8[%c8_12, %c0_13] : memref<24x1xf32, #tpu.memory_space<vmem>>, vector<8x1xf32>
    %14 = vector.broadcast %13 : vector<8x1xf32> to vector<8x128xf32>
    %15 = arith.addf %12, %14 : vector<8x128xf32>
    %c16 = arith.constant 16 : index
    %c0_14 = arith.constant 0 : index
    %16 = vector.load %arg7[%c16, %c0_14] : memref<24x4xf32, #tpu.memory_space<vmem>>, vector<8x4xf32>
    %cst_15 = arith.constant dense<0.000000e+00> : vector<8x128xf32>
    %17 = tpu.matmul %16, %5, %cst_15 {dimension_numbers = #tpu.dot_dimension_numbers<[1], [0], [0], [1], [0, 0, 1, 1], [], []>, precision = #tpu.contract_precision<fp32>} : vector<8x4xf32>, vector<4x128xf32>, vector<8x128xf32> -> vector<8x128xf32>
    %c16_16 = arith.constant 16 : index
    %c0_17 = arith.constant 0 : index
    %18 = vector.load %arg8[%c16_16, %c0_17] : memref<24x1xf32, #tpu.memory_space<vmem>>, vector<8x1xf32>
    %19 = vector.broadcast %18 : vector<8x1xf32> to vector<8x128xf32>
    %20 = arith.addf %17, %19 : vector<8x128xf32>
    %21 = tpu.concatenate %10, %15, %20 in 1 : vector<8x128xf32>, vector<8x128xf32>, vector<8x128xf32> -> vector<8x384xf32>
    %c0_18 = arith.constant 0 : index
    %c0_19 = arith.constant 0 : index
    %22 = vector.load %arg2[%c0_18, %c0_19] : memref<384x128xf32, #tpu.memory_space<vmem>>, vector<384x128xf32>
    %cst_20 = arith.constant dense<0.000000e+00> : vector<8x128xf32>
    %23 = tpu.matmul %21, %22, %cst_20 {dimension_numbers = #tpu.dot_dimension_numbers<[1], [0], [0], [1], [0, 0, 1, 1], [], []>} : vector<8x384xf32>, vector<384x128xf32>, vector<8x128xf32> -> vector<8x128xf32>
    %c0_21 = arith.constant 0 : index
    %c0_22 = arith.constant 0 : index
    %24 = vector.load %arg9[%c0_21, %c0_22] : memref<8x1xf32, #tpu.memory_space<vmem>>, vector<8x1xf32>
    %25 = vector.broadcast %24 : vector<8x1xf32> to vector<8x128xf32>
    %26 = arith.mulf %23, %25 : vector<8x128xf32>
    %c0_23 = arith.constant 0 : index
    %c0_24 = arith.constant 0 : index
    %27 = vector.load %arg10[%c0_23, %c0_24] : memref<8x1xf32, #tpu.memory_space<vmem>>, vector<8x1xf32>
    %28 = vector.broadcast %27 : vector<8x1xf32> to vector<8x128xf32>
    %29 = arith.addf %26, %28 : vector<8x128xf32>
    %cst_25 = arith.constant 0.000000e+00 : f32
    %30 = vector.broadcast %cst_25 : f32 to vector<8x128xf32>
    %31 = arith.maximumf %29, %30 : vector<8x128xf32>
    %32 = arith.truncf %31 : vector<8x128xf32> to vector<8x128xbf16>
    %c0_26 = arith.constant 0 : index
    %c0_27 = arith.constant 0 : index
    %33 = vector.load %arg3[%c0_26, %c0_27] : memref<128x576xbf16, #tpu.memory_space<vmem>>, vector<128x576xbf16>
    %cst_28 = arith.constant dense<0.000000e+00> : vector<8x576xf32>
    %34 = tpu.matmul %32, %33, %cst_28 {dimension_numbers = #tpu.dot_dimension_numbers<[1], [0], [0], [1], [0, 0, 1, 1], [], []>} : vector<8x128xbf16>, vector<128x576xbf16>, vector<8x576xf32> -> vector<8x576xf32>
    %35 = arith.truncf %5 : vector<4x128xf32> to vector<4x128xbf16>
    %c0_29 = arith.constant 0 : index
    %c256 = arith.constant 256 : index
    %36 = vector.load %arg3[%c0_29, %c256] : memref<128x576xbf16, #tpu.memory_space<vmem>>, vector<128x64xbf16>
    %cst_30 = arith.constant dense<0.000000e+00> : vector<4x64xf32>
    %37 = tpu.matmul %35, %36, %cst_30 {dimension_numbers = #tpu.dot_dimension_numbers<[1], [0], [0], [1], [0, 0, 1, 1], [], []>} : vector<4x128xbf16>, vector<128x64xbf16>, vector<4x64xf32> -> vector<4x64xf32>
    %38 = vector.extract_strided_slice %34 {offsets = [0, 0], sizes = [8, 64], strides = [1, 1]} : vector<8x576xf32> to vector<8x64xf32>
    %c0_31 = arith.constant 0 : index
    %c0_32 = arith.constant 0 : index
    %39 = vector.load %arg17[%c0_31, %c0_32] : memref<72x64xf32, #tpu.memory_space<vmem>>, vector<8x64xf32>
    tpu.vector_store %arg17[%c0_31, %c0_32], %38 {strides = array<i32>} : memref<72x64xf32, #tpu.memory_space<vmem>>, vector<8x64xf32>,
    %40 = vector.extract_strided_slice %34 {offsets = [0, 64], sizes = [8, 64], strides = [1, 1]} : vector<8x576xf32> to vector<8x64xf32>
    %c8_33 = arith.constant 8 : index
    %c0_34 = arith.constant 0 : index
    %41 = vector.load %arg17[%c8_33, %c0_34] : memref<72x64xf32, #tpu.memory_space<vmem>>, vector<8x64xf32>
    tpu.vector_store %arg17[%c8_33, %c0_34], %40 {strides = array<i32>} : memref<72x64xf32, #tpu.memory_space<vmem>>, vector<8x64xf32>,
    %42 = vector.extract_strided_slice %34 {offsets = [0, 128], sizes = [8, 64], strides = [1, 1]} : vector<8x576xf32> to vector<8x64xf32>
    %c16_35 = arith.constant 16 : index
    %c0_36 = arith.constant 0 : index
    %43 = vector.load %arg17[%c16_35, %c0_36] : memref<72x64xf32, #tpu.memory_space<vmem>>, vector<8x64xf32>
    tpu.vector_store %arg17[%c16_35, %c0_36], %42 {strides = array<i32>} : memref<72x64xf32, #tpu.memory_space<vmem>>, vector<8x64xf32>,
    %44 = vector.extract_strided_slice %34 {offsets = [0, 192], sizes = [8, 64], strides = [1, 1]} : vector<8x576xf32> to vector<8x64xf32>
    %c24 = arith.constant 24 : index
    %c0_37 = arith.constant 0 : index
    %45 = vector.load %arg17[%c24, %c0_37] : memref<72x64xf32, #tpu.memory_space<vmem>>, vector<8x64xf32>
    tpu.vector_store %arg17[%c24, %c0_37], %44 {strides = array<i32>} : memref<72x64xf32, #tpu.memory_space<vmem>>, vector<8x64xf32>,
    %46 = vector.extract_strided_slice %34 {offsets = [0, 256], sizes = [8, 64], strides = [1, 1]} : vector<8x576xf32> to vector<8x64xf32>
    %c32 = arith.constant 32 : index
    %c0_38 = arith.constant 0 : index
    %47 = vector.load %arg17[%c32, %c0_38] : memref<72x64xf32, #tpu.memory_space<vmem>>, vector<8x64xf32>
    tpu.vector_store %arg17[%c32, %c0_38], %46 {strides = array<i32>} : memref<72x64xf32, #tpu.memory_space<vmem>>, vector<8x64xf32>,
    %48 = vector.extract_strided_slice %34 {offsets = [0, 320], sizes = [8, 64], strides = [1, 1]} : vector<8x576xf32> to vector<8x64xf32>
    %c40 = arith.constant 40 : index
    %c0_39 = arith.constant 0 : index
    %49 = vector.load %arg17[%c40, %c0_39] : memref<72x64xf32, #tpu.memory_space<vmem>>, vector<8x64xf32>
    tpu.vector_store %arg17[%c40, %c0_39], %48 {strides = array<i32>} : memref<72x64xf32, #tpu.memory_space<vmem>>, vector<8x64xf32>,
    %50 = vector.extract_strided_slice %34 {offsets = [0, 384], sizes = [8, 64], strides = [1, 1]} : vector<8x576xf32> to vector<8x64xf32>
    %c48 = arith.constant 48 : index
    %c0_40 = arith.constant 0 : index
    %51 = vector.load %arg17[%c48, %c0_40] : memref<72x64xf32, #tpu.memory_space<vmem>>, vector<8x64xf32>
    tpu.vector_store %arg17[%c48, %c0_40], %50 {strides = array<i32>} : memref<72x64xf32, #tpu.memory_space<vmem>>, vector<8x64xf32>,
    %52 = vector.extract_strided_slice %34 {offsets = [0, 448], sizes = [8, 64], strides = [1, 1]} : vector<8x576xf32> to vector<8x64xf32>
    %c56 = arith.constant 56 : index
    %c0_41 = arith.constant 0 : index
    %53 = vector.load %arg17[%c56, %c0_41] : memref<72x64xf32, #tpu.memory_space<vmem>>, vector<8x64xf32>
    tpu.vector_store %arg17[%c56, %c0_41], %52 {strides = array<i32>} : memref<72x64xf32, #tpu.memory_space<vmem>>, vector<8x64xf32>,
    %54 = vector.extract_strided_slice %34 {offsets = [0, 512], sizes = [8, 64], strides = [1, 1]} : vector<8x576xf32> to vector<8x64xf32>
    %c64 = arith.constant 64 : index
    %c0_42 = arith.constant 0 : index
    %55 = vector.load %arg17[%c64, %c0_42] : memref<72x64xf32, #tpu.memory_space<vmem>>, vector<8x64xf32>
    tpu.vector_store %arg17[%c64, %c0_42], %54 {strides = array<i32>} : memref<72x64xf32, #tpu.memory_space<vmem>>, vector<8x64xf32>,
    %c0_43 = arith.constant 0 : index
    %c0_44 = arith.constant 0 : index
    %56 = vector.load %arg11[%c0_43, %c0_44] : memref<8x72xf32, #tpu.memory_space<vmem>>, vector<8x72xf32>
    %c0_45 = arith.constant 0 : index
    %c0_46 = arith.constant 0 : index
    %57 = vector.load %arg17[%c0_45, %c0_46] : memref<72x64xf32, #tpu.memory_space<vmem>>, vector<72x64xf32>
    %cst_47 = arith.constant dense<0.000000e+00> : vector<8x64xf32>
    %58 = tpu.matmul %56, %57, %cst_47 {dimension_numbers = #tpu.dot_dimension_numbers<[1], [0], [0], [1], [0, 0, 1, 1], [], []>, precision = #tpu.contract_precision<fp32>} : vector<8x72xf32>, vector<72x64xf32>, vector<8x64xf32> -> vector<8x64xf32>
    %c0_48 = arith.constant 0 : index
    %c0_49 = arith.constant 0 : index
    %59 = vector.load %arg12[%c0_48, %c0_49] : memref<8x4xf32, #tpu.memory_space<vmem>>, vector<8x4xf32>
    %cst_50 = arith.constant dense<0.000000e+00> : vector<8x64xf32>
    %60 = tpu.matmul %59, %37, %cst_50 {dimension_numbers = #tpu.dot_dimension_numbers<[1], [0], [0], [1], [0, 0, 1, 1], [], []>, precision = #tpu.contract_precision<fp32>} : vector<8x4xf32>, vector<4x64xf32>, vector<8x64xf32> -> vector<8x64xf32>
    %61 = arith.addf %58, %60 : vector<8x64xf32>
    %c0_51 = arith.constant 0 : index
    %c0_52 = arith.constant 0 : index
    %62 = vector.load %arg13[%c0_51, %c0_52] : memref<8x1xf32, #tpu.memory_space<vmem>>, vector<8x1xf32>
    %63 = vector.broadcast %62 : vector<8x1xf32> to vector<8x64xf32>
    %64 = arith.addf %61, %63 : vector<8x64xf32>
    %cst_53 = arith.constant 0.000000e+00 : f32
    %65 = vector.broadcast %cst_53 : f32 to vector<8x64xf32>
    %66 = arith.cmpf oge, %64, %65 : vector<8x64xf32>
    %cst_54 = arith.constant 2.000000e-01 : f32
    %67 = vector.broadcast %cst_54 : f32 to vector<8x64xf32>
    %68 = arith.mulf %67, %64 : vector<8x64xf32>
    %69 = arith.select %66, %64, %68 : vector<8x64xi1>, vector<8x64xf32>
    %70 = arith.truncf %69 : vector<8x64xf32> to vector<8x64xbf16>
    %c0_55 = arith.constant 0 : index
    %c0_56 = arith.constant 0 : index
    %71 = vector.load %arg4[%c0_55, %c0_56] : memref<64x8xbf16, #tpu.memory_space<vmem>>, vector<64x8xbf16>
    %cst_57 = arith.constant dense<0.000000e+00> : vector<8x8xf32>
    %72 = tpu.matmul %70, %71, %cst_57 {dimension_numbers = #tpu.dot_dimension_numbers<[1], [0], [0], [1], [0, 0, 1, 1], [], []>} : vector<8x64xbf16>, vector<64x8xbf16>, vector<8x8xf32> -> vector<8x8xf32>
    %c0_58 = arith.constant 0 : index
    %c0_59 = arith.constant 0 : index
    %73 = vector.load %arg14[%c0_58, %c0_59] : memref<1x8xf32, #tpu.memory_space<vmem>>, vector<1x8xf32>
    %cst_60 = arith.constant dense<0.000000e+00> : vector<1x8xf32>
    %74 = tpu.matmul %73, %72, %cst_60 {dimension_numbers = #tpu.dot_dimension_numbers<[1], [0], [0], [1], [0, 0, 1, 1], [], []>, precision = #tpu.contract_precision<fp32>} : vector<1x8xf32>, vector<8x8xf32>, vector<1x8xf32> -> vector<1x8xf32>
    %c0_61 = arith.constant 0 : index
    %c0_62 = arith.constant 0 : index
    %75 = vector.load %arg15[%c0_61, %c0_62] : memref<1x1xf32, #tpu.memory_space<vmem>>, vector<1x1xf32>
    %76 = vector.broadcast %75 : vector<1x1xf32> to vector<1x8xf32>
    %77 = arith.addf %74, %76 : vector<1x8xf32>
    %c0_63 = arith.constant 0 : index
    %c0_64 = arith.constant 0 : index
    %c0_65 = arith.constant 0 : index
    %78 = vector.load %arg16[%c0_63, %c0_64, %c0_65] : memref<1x1x8xf32, #tpu.memory_space<vmem>>, vector<1x1x8xf32>
    %79 = vector.shape_cast %78 : vector<1x1x8xf32> to vector<1x8xf32>
    %80 = vector.shape_cast %77 : vector<1x8xf32> to vector<1x1x8xf32>
    tpu.vector_store %arg16[%c0_63, %c0_64, %c0_65], %80 {strides = array<i32>} : memref<1x1x8xf32, #tpu.memory_space<vmem>>, vector<1x1x8xf32>,
    return
  }
  func.func @transform_0(%arg0: i32) -> (i32, i32, i32) {
    %c0_i32 = arith.constant 0 : i32
    %c0_i32_0 = arith.constant 0 : i32
    %c0_i32_1 = arith.constant 0 : i32
    return %arg0, %c0_i32, %c0_i32_0 : i32, i32, i32
  }
  func.func @transform_1(%arg0: i32) -> (i32, i32) {
    %c0_i32 = arith.constant 0 : i32
    %c0_i32_0 = arith.constant 0 : i32
    %c0_i32_1 = arith.constant 0 : i32
    return %c0_i32, %c0_i32_0 : i32, i32
  }
  func.func @transform_2(%arg0: i32) -> (i32, i32) {
    %c0_i32 = arith.constant 0 : i32
    %c0_i32_0 = arith.constant 0 : i32
    %c0_i32_1 = arith.constant 0 : i32
    return %c0_i32, %c0_i32_0 : i32, i32
  }
  func.func @transform_3(%arg0: i32) -> (i32, i32) {
    %c0_i32 = arith.constant 0 : i32
    %c0_i32_0 = arith.constant 0 : i32
    %c0_i32_1 = arith.constant 0 : i32
    return %c0_i32, %c0_i32_0 : i32, i32
  }
  func.func @transform_4(%arg0: i32) -> (i32, i32) {
    %c0_i32 = arith.constant 0 : i32
    %c0_i32_0 = arith.constant 0 : i32
    %c0_i32_1 = arith.constant 0 : i32
    return %c0_i32, %c0_i32_0 : i32, i32
  }
  func.func @transform_5(%arg0: i32) -> (i32, i32) {
    %c0_i32 = arith.constant 0 : i32
    %c0_i32_0 = arith.constant 0 : i32
    %c0_i32_1 = arith.constant 0 : i32
    return %c0_i32, %c0_i32_0 : i32, i32
  }
  func.func @transform_6(%arg0: i32) -> (i32, i32) {
    %c0_i32 = arith.constant 0 : i32
    %c0_i32_0 = arith.constant 0 : i32
    %c0_i32_1 = arith.constant 0 : i32
    return %c0_i32, %c0_i32_0 : i32, i32
  }
  func.func @transform_7(%arg0: i32) -> (i32, i32) {
    %c0_i32 = arith.constant 0 : i32
    %c0_i32_0 = arith.constant 0 : i32
    %c0_i32_1 = arith.constant 0 : i32
    return %c0_i32, %c0_i32_0 : i32, i32
  }
  func.func @transform_8(%arg0: i32) -> (i32, i32) {
    %c0_i32 = arith.constant 0 : i32
    %c0_i32_0 = arith.constant 0 : i32
    %c0_i32_1 = arith.constant 0 : i32
    return %c0_i32, %c0_i32_0 : i32, i32
  }
  func.func @transform_9(%arg0: i32) -> (i32, i32) {
    %c0_i32 = arith.constant 0 : i32
    %c0_i32_0 = arith.constant 0 : i32
    %c0_i32_1 = arith.constant 0 : i32
    return %c0_i32, %c0_i32_0 : i32, i32
  }
  func.func @transform_10(%arg0: i32) -> (i32, i32) {
    %c0_i32 = arith.constant 0 : i32
    %c0_i32_0 = arith.constant 0 : i32
    %c0_i32_1 = arith.constant 0 : i32
    return %c0_i32, %c0_i32_0 : i32, i32
  }
  func.func @transform_11(%arg0: i32) -> (i32, i32) {
    %c0_i32 = arith.constant 0 : i32
    %c0_i32_0 = arith.constant 0 : i32
    %c0_i32_1 = arith.constant 0 : i32
    return %c0_i32, %c0_i32_0 : i32, i32
  }
  func.func @transform_12(%arg0: i32) -> (i32, i32) {
    %c0_i32 = arith.constant 0 : i32
    %c0_i32_0 = arith.constant 0 : i32
    %c0_i32_1 = arith.constant 0 : i32
    return %c0_i32, %c0_i32_0 : i32, i32
  }
  func.func @transform_13(%arg0: i32) -> (i32, i32) {
    %c0_i32 = arith.constant 0 : i32
    %c0_i32_0 = arith.constant 0 : i32
    %c0_i32_1 = arith.constant 0 : i32
    return %c0_i32, %c0_i32_0 : i32, i32
  }
  func.func @transform_14(%arg0: i32) -> (i32, i32) {
    %c0_i32 = arith.constant 0 : i32
    %c0_i32_0 = arith.constant 0 : i32
    %c0_i32_1 = arith.constant 0 : i32
    return %c0_i32, %c0_i32_0 : i32, i32
  }
  func.func @transform_15(%arg0: i32) -> (i32, i32, i32) {
    %c0_i32 = arith.constant 0 : i32
    %c0_i32_0 = arith.constant 0 : i32
    %c0_i32_1 = arith.constant 0 : i32
    return %arg0, %c0_i32, %c0_i32_0 : i32, i32, i32
  }
}

</mosaic_0001>

<bundles_post_ra>
// kernel: model_forward_pallas.1
= control target key start
LH: loop header
LB: loop body
LE: loop exit
PB: predicated region body
PF: predicated region fallthrough
CT: control target
= control target key end

     0   :  { %s3368_s0 = inlined_call_operand.vmem [shape: f32[2,4,128], index: 0, kind: input, shape index: {}]   ;;  %s3369_s1 = inlined_call_operand.vmem [shape: f32[384,128], index: 1, kind: input, shape index: {}]   ;;  %s3370_s2 = inlined_call_operand.vmem [shape: bf16[128,576], index: 2, kind: input, shape index: {}]   ;;  %s3371_s3 = inlined_call_operand.vmem [shape: bf16[64,8], index: 3, kind: input, shape index: {}]   ;;  %s3372_s4 = inlined_call_operand.vmem [shape: f32[4,128], index: 4, kind: input, shape index: {}]   ;;  %s3373_s5 = inlined_call_operand.vmem [shape: f32[4,128], index: 5, kind: input, shape index: {}]   ;;  %s3374_s6 = inlined_call_operand.vmem [shape: f32[24,4], index: 6, kind: input, shape index: {}]   ;;  %s3375_s7 = inlined_call_operand.vmem [shape: f32[24,1], index: 7, kind: input, shape index: {}]   ;;  %s3376_s8 = inlined_call_operand.vmem [shape: f32[8,1], index: 8, kind: input, shape index: {}]   ;;  %s3377_s9 = inlined_call_operand.vmem [shape: f32[8,1], index: 9, kind: input, shape index: {}]   ;;  %s3378_s10 = inlined_call_operand.vmem [shape: f32[8,72], index: 10, kind: input, shape index: {}]   ;;  %s3379_s11 = inlined_call_operand.vmem [shape: f32[8,4], index: 11, kind: input, shape index: {}]   ;;  %s3380_s12 = inlined_call_operand.vmem [shape: f32[8,1], index: 12, kind: input, shape index: {}]   ;;  %s3381_s13 = inlined_call_operand.vmem [shape: f32[1,8], index: 13, kind: input, shape index: {}]   ;;  %s3382_s14 = inlined_call_operand.<no memory space> [shape: f32[1,1], index: 14, kind: input, shape index: {}]   ;;  %s3383_s15 = inlined_call_operand.hbm [shape: f32[2,1,8], index: 15, kind: output, shape index: {}]  }
   0x1   :  { %v20_v0 = vstv %s3382_s14 }
   0x2   :  { %21 = vst [vmem:[#allocation3] sm:$0x1] %v20_v0 }
   0x3   :  { %22 = vsyncpa [#allocation5], 0 }
   0x4   :  { %24 = vsyncpa [#allocation5 + $0x1], 0  ;;  %s2684_s20 = smov 0   ;;  %s2686_s21 = smov 0  }
   0x5   :  { %s2688_s22 = smov 0   ;;  %s2690_s23 = smov 0  }
   0x6 LB: > { %3388 = sst [smem:[#allocation7_spill]] %s2593_s22  ;;  %s2705_s14 = sadd.s32 4294967295, %s2597_s23   ;;  %s2597_s23 = sphi %s2690_s23, %s3395_s23   ;;  %s2593_s22 = sphi %s2688_s22, %s3397_s22   ;;  %s2589_s21 = sphi %s2686_s21, %s3399_s21   ;;  %s2585_s20 = sphi %s2684_s20, %s3398_s20  }
   0x7   : > { %s2223_s24 = sadd.s32 4294967294, %s2597_s23   ;;  %s2709_s25 = sadd.s32 1, %s2597_s23  }
   0x8   : > { %3389 = sst [smem:[#allocation8_spill]] %s2709_s25  ;;  %s357_s26 = sadd.s32 1, %s2593_s22 }
   0x9   : > { %s354_s27 = ssub.s32 %s2597_s23, %s2709_s25  ;;  %p367_p0 = scmp.ne.s32.totalorder %s2593_s22, %s2589_s21 }
   0xa   : > { %p355_p1 = scmp.eq.s32.totalorder %s354_s27, 0  ;;  %p368_p2 = scmp.eq.s32.totalorder %s2705_s14, 1 }
   0xb   : > { %p373_p3 = scmp.ne.s32.totalorder %s2589_s21, %s2585_s20  ;;  %p374_p4 = scmp.eq.s32.totalorder %s2223_s24, 1 }
   0xc   : > { %s2720_s28 = scalar_select %p355_p1, %s2593_s22, %s357_s26  }
   0xd   : > { %p2722_p5 = por %p368_p2, %p367_p0  ;;  %p2726_p6 = por %p374_p4, %p373_p3 }
   0xe   : > { %3390 = sst [smem:[#allocation9_spill]] %s2720_s28  ;;  %p2226_p7 = scmp.ge.s32.totalorder %s2597_s23, 1 }
   0xf   : > { %s3392_s30 = scalar_select %p2726_p6, 1, 0 }
  0x10   : > { %p441_p8 = scmp.lt.s32.totalorder %s2597_s23, 3 }
  0x11   : > { %3393 = sst [smem:[#allocation10_spill]] %s3392_s30 }
  0x12   : > { %p442_p9 = pnand %p2226_p7, %p441_p8 }
  0x13   : > { %p487_p10 = scmp.lt.s32.totalorder (!%p442_p9), %s2705_s14, 1  ;;  %s2600_s25 = smov (!%p442_p9), 64  }
  0x14   : > { %445 = sbr.rel (%p442_p9) target bundleno = 1059 (0x423), region = 80  ;;  %s2164_s19 = scalar_lea.hbm (!%p442_p9), %s3383_s15, %s2705_s14 }
  0x15   : > { %s2555_s17 = scalar_lea.hbm (!%p442_p9), %s3383_s15, 2 }
  0x19   : > { %v497_v1 = vld [vmem:[%s3374_s6] sm:$0xff]  ;;  %vm504_vm0 = vcmask 31744   ;;  %v658_v2 = vld [vmem:[%s3374_s6 + $0x8] sm:$0xff]  ;;  %s488_s24 = scalar_select %p487_p10, %s2705_s14, 1  ;;  %v2599_v5 = vmov 0   ;;  %vm508_vm1 = vcmask 1043456  }
  0x1a   : > { %v506_v3 = vsel %vm504_vm0, %v497_v1, 0  ;;  %v666_v4 = vsel %vm504_vm0, %v658_v2, 0  ;;  %2532 = vset.pattern.permute.xlu0 %v2599_v5  ;;  %v498_v6 = vld [vmem:[%s3375_s7] sm:$0xff]  ;;  %2533 = vset.pattern.permute.xlu1 %v2599_v5  ;;  %v659_v15 = vld [vmem:[%s3375_s7 + $0x8] sm:$0xff]  ;;  %v814_v23 = vld [vmem:[%s3374_s6 + $0x10] sm:$0xff]  ;;  %vm1493_vm2 = vcmask 523264  }
  0x1b   : > { %v529_v7 = vand.u32 4294901760, %v506_v3  ;;  %501 = vperm.xlu0 %2532, %v498_v6   ;;  %2534 = vset.pattern.permute.xlu2 %v2599_v5  ;;  %s2227_s16 = sshll.u32 %s488_s24, 2  ;;  %v493_v8 = vld [vmem:[%s3372_s4] sm:$0xf]  ;;  %v685_v10 = vand.u32 4294901760, %v666_v4  ;;  %v815_v25 = vld [vmem:[%s3375_s7 + $0x10] sm:$0xff] }
  0x1c   : > { %s490_s22 = scalar_lea.vmem %s3368_s0, %s2227_s16  ;;  %v495_v12 = vld [vmem:[%s3373_s5] sm:$0xf]  ;;  %v822_v27 = vsel %vm504_vm0, %v814_v23, 0  ;;  %818 = vperm.xlu1 %2533, %v815_v25   ;;  %v985_v37 = vld [vmem:[%s3369_s1 + $0x78] sm:$0xff]  ;;  %v984_v39 = vld [vmem:[%s3369_s1 + $0x70] sm:$0xff]  ;;  %vm1682_vm3 = vcmask 588800  }
  0x1d   : > { %v530_v9 = vsub.f32 %v506_v3, %v529_v7  ;;  %v492_v11 = vld [vmem:[%s490_s22] sm:$0xf]  ;;  %v686_v18 = vsub.f32 %v666_v4, %v685_v10  ;;  %v841_v30 = vand.u32 4294901760, %v822_v27  ;;  %v1001_v38 = vld [vmem:[%s3369_s1 + $0xf8] sm:$0xff]  ;;  %v1000_v40 = vld [vmem:[%s3369_s1 + $0xf0] sm:$0xff]  ;;  %vm2003_vm5 = vcmask 64512  }
  0x1e   : > { %v494_v13 = vmul.f32 %v493_v8, %v492_v11  ;;  %v1078_v34 = vld [vmem:[%s3376_s8] sm:$0xff]  ;;  %v983_v42 = vld [vmem:[%s3369_s1 + $0x68] sm:$0xff]  ;;  %v981_v44 = vld [vmem:[%s3369_s1 + $0x58] sm:$0xff]  ;;  %s485_s16 = sand.u32 1, %s2589_s21   ;;  %s2168_s22 = sshll.u32 %s2164_s19, 4  ;;  %vm2153_vm6 = vcmask 57344   ;;  %s2169_s22 = int_to_ptr.hbm [resolvable:$true] %s2168_s22 }
  0x1f   : > { %v531_v14 = vand.u32 4294901760, %v530_v9  ;;  %v687_v22 = vand.u32 4294901760, %v686_v18  ;;  %v842_v33 = vsub.f32 %v822_v27, %v841_v30  ;;  %v982_v43 = vld [vmem:[%s3369_s1 + $0x60] sm:$0xff]  ;;  %v980_v45 = vld [vmem:[%s3369_s1 + $0x50] sm:$0xff]  ;;  %v979_v46 = vld [vmem:[%s3369_s1 + $0x48] sm:$0xff]  ;;  %s486_s26 = scalar_lea.vmem [#allocation4], %s485_s16 }
  0x20   : > { %v2757_v16 = vadd.f32 %v495_v12, %v494_v13  ;;  %v978_v47 = vld [vmem:[%s3369_s1 + $0x40] sm:$0xff]  ;;  %v977_v48 = vld [vmem:[%s3369_s1 + $0x38] sm:$0xff]  ;;  %v999_v49 = vld [vmem:[%s3369_s1 + $0xe8] sm:$0xff]  ;;  %s2166_s24 = sshll.u32 %s486_s26, 4  ;;  %s2549_s28 = sshra.s32 %s2169_s22, 4  ;;  %s2167_s24 = int_to_ptr.vmem [resolvable:$true] %s2166_s24  ;;  %s2550_s28 = int_to_ptr.hbm [resolvable:$true] %s2549_s28 }
  0x21   : > { %v532_v17 = vsub.f32 %v530_v9, %v531_v14  ;;  %v688_v28 = vsub.f32 %v686_v18, %v687_v22  ;;  %v843_v35 = vand.u32 4294901760, %v842_v33  ;;  %v976_v50 = vld [vmem:[%s3369_s1 + $0x30] sm:$0xff]  ;;  %v998_v51 = vld [vmem:[%s3369_s1 + $0xe0] sm:$0xff]  ;;  %v975_v52 = vld [vmem:[%s3369_s1 + $0x28] sm:$0xff]  ;;  %s2551_s30 = scalar_lea.hbm %s2550_s28, 1  ;;  %p2556_p0 = scmp.lt.s32.totalorder %s2550_s28, %s3383_s15 }
  0x22   : > { %v510_v19 = vsel %vm508_vm1, %v2757_v16, 0  ;;  %v997_v53 = vld [vmem:[%s3369_s1 + $0xd8] sm:$0xff]  ;;  %v974_v54 = vld [vmem:[%s3369_s1 + $0x20] sm:$0xff]  ;;  %v996_v55 = vld [vmem:[%s3369_s1 + $0xd0] sm:$0xff]  ;;  %p2552_p11 = scmp.ne.s32.totalorder %s2550_s28, %s2551_s30  ;;  %p2557_p1 = scmp.lt.s32.totalorder %s2555_s17, %s2551_s30 }
  0x23   : > { %v533_v20 = vand.u32 4294901760, %v532_v17  ;;  %662 = vperm.xlu0 %2532, %v659_v15   ;;  %v527_v21 = vand.u32 4294901760, %v510_v19  ;;  %v689_v32 = vand.u32 4294901760, %v688_v28  ;;  %v844_v36 = vsub.f32 %v842_v33, %v843_v35  ;;  %v973_v56 = vld [vmem:[%s3369_s1 + $0x18] sm:$0xff]  ;;  %v995_v57 = vld [vmem:[%s3369_s1 + $0xc8] sm:$0xff]  ;;  %v972_v59 = vld [vmem:[%s3369_s1 + $0x10] sm:$0xff] }
  0x24   : > { %1081 = vperm.xlu1 %2533, %v1078_v34   ;;  %v1017_v58 = vld [vmem:[%s3369_s1 + $0x178] sm:$0xff]  ;;  %v994_v60 = vld [vmem:[%s3369_s1 + $0xc0] sm:$0xff]  ;;  %v1016_v61 = vld [vmem:[%s3369_s1 + $0x170] sm:$0xff]  ;;  %p2553_p12 = pnand %p2552_p11, %p2722_p5  ;;  %p2558_p2 = por %p2557_p1, %p2556_p0 }
  0x25   : > { %v554_v24 = vsub.f32 %v510_v19, %v527_v21  ;;  %528 = vmatpush.msra.mxu0 %v527_v21  ;;  %604 = vmatpush.msra.mxu3 %v527_v21  ;;  %v845_v41 = vand.u32 4294901760, %v844_v36  ;;  %v971_v62 = vld [vmem:[%s3369_s1 + $0x8] sm:$0xff]  ;;  %v993_v63 = vld [vmem:[%s3369_s1 + $0xb8] sm:$0xff]  ;;  %v970_v1 = vld [vmem:[%s3369_s1] sm:$0xff] }
  0x26   : > { %534 = vmatmul.f32.vlgmr.msra.gmra.mxu0 %v533_v20  ;;  %608 = vmatmul.f32.vlgmr.msra.gmra.mxu3 %v531_v14  ;;  %v1015_v0 = vld [vmem:[%s3369_s1 + $0x168] sm:$0xff]  ;;  %v992_v2 = vld [vmem:[%s3369_s1 + $0xb0] sm:$0xff]  ;;  %v1014_v3 = vld [vmem:[%s3369_s1 + $0x160] sm:$0xff]  ;;  %p2554_p13 = pneg %p2553_p12 }
  0x27   : > { %581 = vmatpush.msra.mxu2 %v554_v24  ;;  %v555_v26 = vand.u32 4294901760, %v554_v24  ;;  %v991_v4 = vld [vmem:[%s3369_s1 + $0xa8] sm:$0xff]  ;;  %v1013_v5 = vld [vmem:[%s3369_s1 + $0x158] sm:$0xff]  ;;  %v990_v6 = vld [vmem:[%s3369_s1 + $0xa0] sm:$0xff] }
  0x28   : > { %584 = vmatmul.f32.vlgmr.msra.gmra.mxu2 %v530_v9  ;;  %v989_v8 = vld [vmem:[%s3369_s1 + $0x98] sm:$0xff]  ;;  %v1011_v9 = vld [vmem:[%s3369_s1 + $0x148] sm:$0xff]  ;;  %v1010_v11 = vld [vmem:[%s3369_s1 + $0x140] sm:$0xff]  ;;  %p2559_p3 = pnand %p2558_p2, %p2554_p13 }
  0x29   : > { %v556_v29 = vsub.f32 %v554_v24, %v555_v26  ;;  %684 = vmatpush.msrb.mxu2 %v527_v21  ;;  %630 = vmatpush.msrb.mxu0 %v555_v26  ;;  %v987_v12 = vld [vmem:[%s3369_s1 + $0x88] sm:$0xff]  ;;  %v1009_v13 = vld [vmem:[%s3369_s1 + $0x138] sm:$0xff]  ;;  %v986_v14 = vld [vmem:[%s3369_s1 + $0x80] sm:$0xff] }
  0x2a   : > { %v1008_v15 = vld [vmem:[%s3369_s1 + $0x130] sm:$0xff]  ;;  %v1007_v17 = vld [vmem:[%s3369_s1 + $0x128] sm:$0xff]  ;;  %v1006_v19 = vld [vmem:[%s3369_s1 + $0x120] sm:$0xff] }
  0x2b   : > { %737 = vmatpush.msra.mxu0 %v554_v24  ;;  %786 = vmatpush.msra.mxu2 %v555_v26  ;;  %v557_v31 = vand.u32 4294901760, %v556_v29  ;;  %v1004_v23 = vld [vmem:[%s3369_s1 + $0x110] sm:$0xff]  ;;  %v1003_v25 = vld [vmem:[%s3369_s1 + $0x108] sm:$0xff]  ;;  %v2474_v36 = vld [vmem:[%s3370_s2 + $0x11c] sm:$0xf] }
  0x2c   : > { %v2476_v34 = vld [vmem:[%s3370_s2 + $0x128] sm:$0xf0] }
  0x2d   : > { %558 = vmatpush.msra.mxu1 %v557_v31  ;;  %714 = vmatpush.msrb.mxu3 %v557_v31 }
  0x2e   : > { %560 = vmatmul.f32.vlgmr.msra.gmra.mxu1 %v529_v7  ;;  %632 = vmatmul.f32.vlgmr.msrb.gmra.mxu0 %v529_v7 }
  0x2f   : > { %716 = vmatmul.f32.vlgmr.msrb.gmra.mxu3 %v685_v10  ;;  %652 = vmatpush.msrb.mxu1 %v527_v21 }
  0x30   : > { %690 = vmatmul.f32.vlgmr.msrb.gmra.mxu2 %v689_v32  ;;  %808 = vmatpush.msra.mxu3 %v527_v21  ;;  %v1085_v32 = vld [vmem:[%s3377_s9] sm:$0xff] }
  0x31   : > { %760 = vmatpush.msra.mxu1 %v527_v21  ;;  %893 = vmatpush.msrb.mxu2 %v554_v24 }
  0x32   : > { %840 = vmatpush.msrb.mxu0 %v527_v21  ;;  %916 = vmatpush.msrb.mxu3 %v527_v21 }
  0x33   : > { %1088 = vperm.xlu2 %2534, %v1085_v32   ;;  %v2454_v32 = vld [vmem:[%s3370_s2 + $0x7c] sm:$0xf] }
  0x36   : > { %654 = vmatmul.f32.vlgmr.msrb.gmra.mxu1 %v529_v7  ;;  %740 = vmatmul.f32.vlgmr.msra.gmra.mxu0 %v686_v18  ;;  %v1012_v7 = vld [vmem:[%s3369_s1 + $0x150] sm:$0xff] }
  0x37   : > { %810 = vmatmul.f32.vlgmr.msra.gmra.mxu3 %v685_v10  ;;  %870 = vmatpush.msrb.mxu1 %v557_v31 }
  0x38   : > { %788 = vmatmul.f32.vlgmr.msra.gmra.mxu2 %v685_v10  ;;  %942 = vmatpush.msra.mxu0 %v555_v26  ;;  %v988_v10 = vld [vmem:[%s3369_s1 + $0x90] sm:$0xff] }
  0x39   : > { %1018 = vmatpush.msra.mxu2 %v985_v37  ;;  %1038 = vmatpush.msra.mxu3 %v1001_v38  ;;  %v2372_v37 = vld [vmem:[%s3370_s2 + $0x12c] sm:$0xf0] }
  0x3a   : > { %v2350_v38 = vld [vmem:[%s3370_s2 + $0xf0] sm:$0xf] }
  0x3b   : > { %1019 = vmatpush.msra.mxu2 %v984_v39  ;;  %1039 = vmatpush.msra.mxu3 %v1000_v40  ;;  %v2375_v40 = vor.u32 %v2474_v36, %v2372_v37  ;;  %v2472_v36 = vld [vmem:[%s3370_s2 + $0x108] sm:$0xf0] }
  0x3d   : > { %1020 = vmatpush.msra.mxu2 %v983_v42  ;;  %1040 = vmatpush.msra.mxu3 %v999_v49  ;;  %v2469_v42 = vld [vmem:[%s3370_s2 + $0xf4] sm:$0xf]  ;;  %v2466_v49 = vld [vmem:[%s3370_s2 + $0xd8] sm:$0xf0] }
  0x3e   : > { %764 = vmatmul.f32.vlgmr.msra.gmra.mxu1 %v687_v22  ;;  %846 = vmatmul.f32.vlgmr.msrb.gmra.mxu0 %v845_v41  ;;  %v2471_v41 = vld [vmem:[%s3370_s2 + $0x100] sm:$0xf0] }
  0x3f   : > { %920 = vmatmul.f32.vlgmr.msrb.gmra.mxu3 %v843_v35  ;;  %964 = vmatpush.msra.mxu1 %v527_v21  ;;  %v1005_v21 = vld [vmem:[%s3369_s1 + $0x118] sm:$0xff] }
  0x40   : > { %896 = vmatmul.f32.vlgmr.msrb.gmra.mxu2 %v842_v33  ;;  %1041 = vmatpush.msra.mxu3 %v998_v51  ;;  %v2370_v33 = vld [vmem:[%s3370_s2 + $0x118] sm:$0xf] }
  0x41   : > { %1021 = vmatpush.msra.mxu2 %v982_v43  ;;  %1058 = vmatpush.msrb.mxu0 %v1017_v58  ;;  %v2371_v35 = vor.u32 %v2476_v34, %v2370_v33  ;;  %v2352_v43 = vld [vmem:[%s3370_s2 + $0x104] sm:$0xf0]  ;;  %v2477_v58 = vld [vmem:[%s3370_s2 + $0x130] sm:$0xf0]  ;;  %v2292_v34 = vld [vmem:[%s3370_s2 + $0x8c] sm:$0xf0] }
  0x42   : > { %1042 = vmatpush.msra.mxu3 %v997_v53  ;;  %v2464_v53 = vld [vmem:[%s3370_s2 + $0xcc] sm:$0xf]  ;;  %v2295_v37 = vor.u32 %v2454_v32, %v2292_v34  ;;  %v2447_v34 = vld [vmem:[%s3370_s2 + $0x40] sm:$0xf0] }
  0x43   : > { %1022 = vmatpush.msra.mxu2 %v981_v44  ;;  %1059 = vmatpush.msrb.mxu0 %v1016_v61  ;;  %v2351_v44 = vor.u32 %v2471_v41, %v2350_v38  ;;  %v2270_v41 = vld [vmem:[%s3370_s2 + $0x50] sm:$0xf] }
  0x44   : > { %1043 = vmatpush.msra.mxu3 %v996_v55  ;;  %v2378_v55 = vld [vmem:[%s3370_s2 + $0x120] sm:$0xf] }
  0x45   : > { %1023 = vmatpush.msra.mxu2 %v980_v45  ;;  %1060 = vmatpush.msrb.mxu0 %v1015_v0 }
  0x46   : > { %872 = vmatmul.f32.vlgmr.msrb.gmra.mxu1 %v841_v30  ;;  %944 = vmatmul.f32.vlgmr.msra.gmra.mxu0 %v841_v30 }
  0x47   : > { %1024 = vmatpush.msra.mxu2 %v979_v46  ;;  %1044 = vmatpush.msra.mxu3 %v995_v57 }
  0x48   : > { %1061 = vmatpush.msrb.mxu0 %v1014_v3  ;;  %1350 = vmatpush.bf16.msrb.mxu1 %v2371_v35  ;;  %v2461_v3 = vld [vmem:[%s3370_s2 + $0xb0] sm:$0xf0]  ;;  %v2358_v35 = vld [vmem:[%s3370_s2 + $0xf8] sm:$0xf] }
  0x49   : > { %1025 = vmatpush.msra.mxu2 %v978_v47  ;;  %1045 = vmatpush.msra.mxu3 %v994_v60  ;;  %v2380_v60 = vld [vmem:[%s3370_s2 + $0x134] sm:$0xf0]  ;;  %v2359_v38 = vor.u32 %v2472_v36, %v2358_v35  ;;  %v2445_v35 = vld [vmem:[%s3370_s2 + $0x34] sm:$0xf] }
  0x4a   : > { %1062 = vmatpush.msrb.mxu0 %v1013_v5  ;;  %v2459_v5 = vld [vmem:[%s3370_s2 + $0xa4] sm:$0xf] }
  0x4b   : > { %1026 = vmatpush.msra.mxu2 %v977_v48  ;;  %1046 = vmatpush.msra.mxu3 %v993_v63  ;;  %v2330_v48 = vld [vmem:[%s3370_s2 + $0xc8] sm:$0xf]  ;;  %v2379_v63 = vor.u32 %v2477_v58, %v2378_v55 }
  0x4c   : > { %1063 = vmatpush.msrb.mxu0 %v1012_v7  ;;  %1351 = vmatpush.bf16.msrb.mxu1 %v2351_v44  ;;  %v2449_v44 = vld [vmem:[%s3370_s2 + $0x54] sm:$0xf]  ;;  %v2318_v58 = vld [vmem:[%s3370_s2 + $0xa8] sm:$0xf] }
  0x4d   : > { %1027 = vmatpush.msra.mxu2 %v976_v50  ;;  %1047 = vmatpush.msra.mxu3 %v992_v2  ;;  %v2310_v2 = vld [vmem:[%s3370_s2 + $0xa0] sm:$0xf] }
  0x4e   : > { %966 = vmatmul.f32.vlgmr.msra.gmra.mxu1 %v841_v30  ;;  %1064 = vmatpush.msrb.mxu0 %v1011_v9  ;;  %v1002_v30 = vld [vmem:[%s3369_s1 + $0x100] sm:$0xff]  ;;  %v2311_v7 = vor.u32 %v2461_v3, %v2310_v2  ;;  %v2441_v3 = vld [vmem:[%s3370_s2 + $0x10] sm:$0xf0] }
  0x4f   : > { %1028 = vmatpush.msra.mxu2 %v975_v52  ;;  %1048 = vmatpush.msra.mxu3 %v991_v4  ;;  %v2355_v52 = vor.u32 %v2469_v42, %v2352_v43  ;;  %v2451_v43 = vld [vmem:[%s3370_s2 + $0x60] sm:$0xf0]  ;;  %v2230_v2 = vld [vmem:[%s3370_s2] sm:$0xf] }
  0x50   : > { %1065 = vmatpush.msrb.mxu0 %v1010_v11 }
  0x51   : > { %1029 = vmatpush.msra.mxu2 %v974_v54  ;;  %1049 = vmatpush.msra.mxu3 %v990_v6  ;;  %v2332_v54 = vld [vmem:[%s3370_s2 + $0xdc] sm:$0xf0]  ;;  %v2312_v6 = vld [vmem:[%s3370_s2 + $0xb4] sm:$0xf0] }
  0x52   : > { %1066 = vmatpush.msrb.mxu0 %v1009_v13  ;;  %v2335_v4 = vor.u32 %v2464_v53, %v2332_v54  ;;  %v2250_v53 = vld [vmem:[%s3370_s2 + $0x28] sm:$0xf]  ;;  %v2446_v54 = vld [vmem:[%s3370_s2 + $0x38] sm:$0xf0] }
  0x53   : > { %1030 = vmatpush.msra.mxu2 %v973_v56  ;;  %1050 = vmatpush.msra.mxu3 %v989_v8 }
  0x54   : > { %1067 = vmatpush.msrb.mxu0 %v1008_v15 }
  0x55   : > { %1031 = vmatpush.msra.mxu2 %v972_v59  ;;  %1051 = vmatpush.msra.mxu3 %v988_v10  ;;  %v2475_v59 = vld [vmem:[%s3370_s2 + $0x124] sm:$0xf] }
  0x56   : > { %1068 = vmatpush.msrb.mxu0 %v1007_v17  ;;  %v2383_v0 = vor.u32 %v2475_v59, %v2380_v60  ;;  %v2251_v59 = vor.u32 %v2446_v54, %v2250_v53  ;;  %v2462_v60 = vld [vmem:[%s3370_s2 + $0xb8] sm:$0xf0]  ;;  %v2406_v54 = vld [vmem:[%s3370_s2 + $0xa8] sm:$0xf] }
  0x57   : > { %1032 = vmatpush.msra.mxu2 %v971_v62  ;;  %1052 = vmatpush.msra.mxu3 %v987_v12  ;;  %v2331_v62 = vor.u32 %v2466_v49, %v2330_v48  ;;  %v2315_v12 = vor.u32 %v2459_v5, %v2312_v6  ;;  %v2338_v48 = vld [vmem:[%s3370_s2 + $0xd0] sm:$0xf]  ;;  %v2467_v49 = vld [vmem:[%s3370_s2 + $0xe0] sm:$0xf0]  ;;  %v2231_v5 = vor.u32 %v2441_v3, %v2230_v2  ;;  %v2232_v6 = vld [vmem:[%s3370_s2 + $0x14] sm:$0xf0] }
  0x58   : > { %1069 = vmatpush.msrb.mxu0 %v1006_v19  ;;  %v2481_v2 = vld [vmem:[%s3370_s2 + $0x68] sm:$0xf0] }
  0x59   : > { %1033 = vmatpush.msra.mxu2 %v970_v1  ;;  %1053 = vmatpush.msra.mxu3 %v986_v14 }
  0x5a   : > { %1070 = vmatpush.msrb.mxu0 %v1005_v21  ;;  %1352 = vmatpush.bf16.msrb.mxu1 %v2331_v62  ;;  %v2320_v62 = vld [vmem:[%s3370_s2 + $0xbc] sm:$0xf0] }
  0x5b   : > { %1363 = vmatpush.bf16.msrb.mxu2 %v2375_v40  ;;  %1376 = vmatpush.bf16.msrb.mxu3 %v2379_v63  ;;  %v2360_v40 = vld [vmem:[%s3370_s2 + $0x10c] sm:$0xf0] }
  0x5c   : > { %1071 = vmatpush.msrb.mxu0 %v1004_v23 }
  0x5e   : > { %1072 = vmatpush.msrb.mxu0 %v1003_v25  ;;  %1353 = vmatpush.bf16.msrb.mxu1 %v2311_v7  ;;  %v2298_v7 = vld [vmem:[%s3370_s2 + $0x80] sm:$0xf] }
  0x5f   : > { %1364 = vmatpush.bf16.msrb.mxu2 %v2355_v52  ;;  %1377 = vmatpush.bf16.msrb.mxu3 %v2359_v38  ;;  %v2340_v52 = vld [vmem:[%s3370_s2 + $0xe4] sm:$0xf0]  ;;  %v2346_v38 = vld [vmem:[%s3370_s2 + $0xd8] sm:$0xf] }
  0x60   : > { %1073 = vmatpush.msrb.mxu0 %v1002_v30  ;;  %v2290_v30 = vld [vmem:[%s3370_s2 + $0x78] sm:$0xf] }
  0x62   : > { %1389 = vmatpush.bf16.msra.mxu0 %v2383_v0  ;;  %v2319_v0 = vor.u32 %v2462_v60, %v2318_v58  ;;  %v2458_v58 = vld [vmem:[%s3370_s2 + $0x98] sm:$0xf0] }
  0x63   : > { %1365 = vmatpush.bf16.msrb.mxu2 %v2335_v4  ;;  %v2439_v4 = vld [vmem:[%s3370_s2 + $0x4] sm:$0xf] }
  0x67   : > { %1366 = vmatpush.bf16.msrb.mxu2 %v2315_v12  ;;  %v2300_v12 = vld [vmem:[%s3370_s2 + $0x94] sm:$0xf0] }
  0x6b   : > { %1367 = vmatpush.bf16.msrb.mxu2 %v2295_v37  ;;  %v2260_v37 = vld [vmem:[%s3370_s2 + $0x44] sm:$0xf0] }
  0x8d   : > { %v502_v20 = vpop.permute.xlu0 %501 }
  0x8e   : > { %v819_v17 = vpop.permute.xlu1 %818 }
  0x95   : > { %v663_v46 = vpop.permute.xlu0 %662 }
  0xa3   : > { %v535_v18 = vpop.f32.mrf.mxu0 }
  0xa4   : > { %v536_v22 = vadd.f32 %v535_v18, %v502_v20 }
  0xa9   : > { %v609_v24 = vpop.f32.mrf.mxu3 }
  0xab   : > { %v561_v26 = vpop.f32.mrf.mxu1  ;;  %v585_v27 = vpop.f32.mrf.mxu2 }
  0xac   : > { %v562_v28 = vadd.f32 %v561_v26, %v536_v22  ;;  %v633_v29 = vpop.f32.mrf.mxu0 }
  0xae   : > { %v586_v31 = vadd.f32 %v585_v27, %v562_v28 }
  0xb0   : > { %v610_v39 = vadd.f32 %v609_v24, %v586_v31  ;;  %v2456_v31 = vld [vmem:[%s3370_s2 + $0x88] sm:$0xf0] }
  0xb1   : > { %v2291_v33 = vor.u32 %v2456_v31, %v2290_v30  ;;  %v2414_v30 = vld [vmem:[%s3370_s2 + $0xf8] sm:$0xf]  ;;  %v2485_v31 = vld [vmem:[%s3370_s2 + $0x108] sm:$0xf0] }
  0xb2   : > { %v634_v45 = vadd.f32 %v633_v29, %v610_v39  ;;  %v717_v47 = vpop.f32.mrf.mxu3  ;;  %v2470_v39 = vld [vmem:[%s3370_s2 + $0xfc] sm:$0xf]  ;;  %v2415_v32 = vor.u32 %v2485_v31, %v2414_v30 }
  0xb3   : > { %v655_v50 = vpop.f32.mrf.mxu1  ;;  %v691_v51 = vpop.f32.mrf.mxu2  ;;  %1354 = vmatpush.bf16.msrb.mxu1 %v2291_v33  ;;  %v2363_v42 = vor.u32 %v2470_v39, %v2360_v40  ;;  %v2258_v33 = vld [vmem:[%s3370_s2 + $0x30] sm:$0xf]  ;;  %v2468_v39 = vld [vmem:[%s3370_s2 + $0xe8] sm:$0xf0]  ;;  %v2263_v40 = vor.u32 %v2445_v35, %v2260_v37 }
  0xb4   : > { %v656_v56 = vadd.f32 %v655_v50, %v634_v45  ;;  %v692_v57 = vadd.f32 %v691_v51, %v663_v46  ;;  %v741_v61 = vpop.f32.mrf.mxu0  ;;  %v2272_v45 = vld [vmem:[%s3370_s2 + $0x64] sm:$0xf0]  ;;  %v2271_v46 = vor.u32 %v2451_v43, %v2270_v41  ;;  %v2465_v50 = vld [vmem:[%s3370_s2 + $0xd4] sm:$0xf]  ;;  %v2339_v51 = vor.u32 %v2467_v49, %v2338_v48  ;;  %v2484_v43 = vld [vmem:[%s3370_s2 + $0xe0] sm:$0xf0] }
  0xb5   : > { %1390 = vmatpush.bf16.msra.mxu0 %v2363_v42  ;;  %v2343_v55 = vor.u32 %v2465_v50, %v2340_v52  ;;  %v2259_v36 = vor.u32 %v2447_v34, %v2258_v33  ;;  %v2347_v41 = vor.u32 %v2468_v39, %v2346_v38  ;;  %v2410_v42 = vld [vmem:[%s3370_s2 + $0xd0] sm:$0xf]  ;;  %v2240_v49 = vld [vmem:[%s3370_s2 + $0x1c] sm:$0xf0]  ;;  %v1996_v38 = vld [vmem:[#allocation3] sm:$0x1] }
  0xb6   : > { %v718_v1 = vadd.f32 %v717_v47, %v692_v57  ;;  %1034 = vmatmul.f32.vlgmr.msra.gmra.mxu2 %v656_v56  ;;  %v2275_v47 = vor.u32 %v2449_v44, %v2272_v45  ;;  %v2444_v56 = vld [vmem:[%s3370_s2 + $0x2c] sm:$0xf]  ;;  %v2252_v57 = vld [vmem:[%s3370_s2 + $0x3c] sm:$0xf0]  ;;  %1378 = vmatpush.bf16.msrb.mxu3 %v2339_v51  ;;  %v2411_v44 = vor.u32 %v2484_v43, %v2410_v42  ;;  %v2238_v45 = vld [vmem:[%s3370_s2 + $0x8] sm:$0xf] }
  0xb7   : > { %1355 = vmatpush.bf16.msrb.mxu1 %v2271_v46  ;;  %v2255_v63 = vor.u32 %v2444_v56, %v2252_v57  ;;  %v2442_v46 = vld [vmem:[%s3370_s2 + $0x18] sm:$0xf0]  ;;  %v2326_v50 = vld [vmem:[%s3370_s2 + $0xb0] sm:$0xf]  ;;  %v2463_v51 = vld [vmem:[%s3370_s2 + $0xc0] sm:$0xf0] }
  0xb8   : > { %v742_v8 = vadd.f32 %v741_v61, %v718_v1  ;;  %v2460_v61 = vld [vmem:[%s3370_s2 + $0xac] sm:$0xf]  ;;  %1368 = vmatpush.bf16.msrb.mxu2 %v2275_v47  ;;  %v2239_v48 = vor.u32 %v2442_v46, %v2238_v45  ;;  %v2327_v53 = vor.u32 %v2463_v51, %v2326_v50  ;;  %v2306_v57 = vld [vmem:[%s3370_s2 + $0x88] sm:$0xf] }
  0xb9   : > { %1391 = vmatpush.bf16.msra.mxu0 %v2343_v55  ;;  %v2323_v1 = vor.u32 %v2460_v61, %v2320_v62  ;;  %v2440_v47 = vld [vmem:[%s3370_s2 + $0xc] sm:$0xf]  ;;  %v2483_v55 = vld [vmem:[%s3370_s2 + $0xb8] sm:$0xf0]  ;;  %v2307_v60 = vor.u32 %v2458_v58, %v2306_v57  ;;  %v2482_v61 = vld [vmem:[%s3370_s2 + $0x90] sm:$0xf0] }
  0xba   : > { %v811_v9 = vpop.f32.mrf.mxu3  ;;  %1379 = vmatpush.bf16.msrb.mxu3 %v2319_v0  ;;  %v2243_v52 = vor.u32 %v2440_v47, %v2240_v49  ;;  %v2407_v56 = vor.u32 %v2483_v55, %v2406_v54  ;;  %v2453_v0 = vld [vmem:[%s3370_s2 + $0x70] sm:$0xf0] }
  0xbb   : > { %v765_v10 = vpop.f32.mrf.mxu1  ;;  %v789_v11 = vpop.f32.mrf.mxu2  ;;  %1356 = vmatpush.bf16.msrb.mxu1 %v2251_v59  ;;  %v2402_v59 = vld [vmem:[%s3370_s2 + $0x80] sm:$0xf] }
  0xbc   : > { %v766_v13 = vadd.f32 %v765_v10, %v742_v8  ;;  %v847_v14 = vpop.f32.mrf.mxu0  ;;  %1369 = vmatpush.bf16.msrb.mxu2 %v2255_v63  ;;  %v2457_v8 = vld [vmem:[%s3370_s2 + $0x90] sm:$0xf0]  ;;  %v2403_v62 = vor.u32 %v2482_v61, %v2402_v59  ;;  %v2286_v63 = vld [vmem:[%s3370_s2 + $0x60] sm:$0xf] }
  0xbd   : > { %v848_v19 = vadd.f32 %v847_v14, %v819_v17  ;;  %1392 = vmatpush.bf16.msra.mxu0 %v2323_v1  ;;  %v2299_v10 = vor.u32 %v2457_v8, %v2298_v7  ;;  %v2418_v17 = vld [vmem:[%s3370_s2 + $0x120] sm:$0xf]  ;;  %v2398_v1 = vld [vmem:[%s3370_s2 + $0x58] sm:$0xf]  ;;  %v2287_v3 = vor.u32 %v2453_v0, %v2286_v63  ;;  %v2394_v7 = vld [vmem:[%s3370_s2 + $0x30] sm:$0xf] }
  0xbe   : > { %v790_v15 = vadd.f32 %v789_v11, %v766_v13  ;;  %v2455_v11 = vld [vmem:[%s3370_s2 + $0x84] sm:$0xf]  ;;  %v2386_v13 = vld [vmem:[%s3370_s2 + $0x128] sm:$0xf] }
  0xbf   : > { %1357 = vmatpush.bf16.msrb.mxu1 %v2231_v5  ;;  %v2303_v14 = vor.u32 %v2455_v11, %v2300_v12  ;;  %1380 = vmatpush.bf16.msrb.mxu3 %v2299_v10  ;;  %v2266_v5 = vld [vmem:[%s3370_s2 + $0x38] sm:$0xf]  ;;  %v2480_v8 = vld [vmem:[%s3370_s2 + $0x40] sm:$0xf0]  ;;  %v2246_v11 = vld [vmem:[%s3370_s2 + $0x10] sm:$0xf] }
  0xc0   : > { %v812_v18 = vadd.f32 %v811_v9, %v790_v15  ;;  %v2235_v9 = vor.u32 %v2439_v4, %v2232_v6  ;;  %v2478_v15 = vld [vmem:[%s3370_s2 + $0x138] sm:$0xf0]  ;;  %v2399_v4 = vor.u32 %v2481_v2, %v2398_v1  ;;  %v2448_v6 = vld [vmem:[%s3370_s2 + $0x48] sm:$0xf0]  ;;  %v2395_v10 = vor.u32 %v2480_v8, %v2394_v7  ;;  %v2443_v12 = vld [vmem:[%s3370_s2 + $0x20] sm:$0xf0] }
  0xc1   : > { %1393 = vmatpush.bf16.msra.mxu0 %v2303_v14  ;;  %v2479_v14 = vld [vmem:[%s3370_s2 + $0x18] sm:$0xf0] }
  0xc2   : > { %1054 = vmatmul.f32.vlgmr.msra.gmra.mxu3 %v812_v18  ;;  %v921_v23 = vpop.f32.mrf.mxu3  ;;  %v2486_v18 = vld [vmem:[%s3370_s2 + $0x130] sm:$0xf0]  ;;  %1370 = vmatpush.bf16.msrb.mxu2 %v2235_v9  ;;  %v2267_v9 = vor.u32 %v2448_v6, %v2266_v5 }
  0xc3   : > { %v873_v20 = vpop.f32.mrf.mxu1  ;;  %v897_v21 = vpop.f32.mrf.mxu2 }
  0xc4   : > { %v874_v22 = vadd.f32 %v873_v20, %v848_v19  ;;  %v945_v25 = vpop.f32.mrf.mxu0  ;;  %v2387_v19 = vor.u32 %v2478_v15, %v2386_v13  ;;  %v2419_v20 = vor.u32 %v2486_v18, %v2418_v17  ;;  %v2390_v13 = vld [vmem:[%s3370_s2 + $0x8] sm:$0xf]  ;;  %v2247_v15 = vor.u32 %v2443_v12, %v2246_v11  ;;  %v1519_v12 = vld [vmem:[%s3378_s10] sm:$0xff] }
  0xc5   : > { %v2391_v17 = vor.u32 %v2479_v14, %v2390_v13 }
  0xc6   : > { %v898_v24 = vadd.f32 %v897_v21, %v874_v22  ;;  %v2278_v21 = vld [vmem:[%s3370_s2 + $0x58] sm:$0xf]  ;;  %v2452_v22 = vld [vmem:[%s3370_s2 + $0x68] sm:$0xf0]  ;;  %1402 = vmatpush.bf16.msra.mxu1 %v2387_v19  ;;  %1480 = vmatpush.bf16.msra.mxu2 %v2419_v20 }
  0xc8   : > { %v922_v26 = vadd.f32 %v921_v23, %v898_v24  ;;  %v2450_v23 = vld [vmem:[%s3370_s2 + $0x5c] sm:$0xf]  ;;  %v2279_v24 = vor.u32 %v2452_v22, %v2278_v21 }
  0xca   : > { %v946_v27 = vadd.f32 %v945_v25, %v922_v26  ;;  %v2280_v25 = vld [vmem:[%s3370_s2 + $0x6c] sm:$0xf0]  ;;  %v2366_v26 = vld [vmem:[%s3370_s2 + $0x100] sm:$0xf]  ;;  %1381 = vmatpush.bf16.msrb.mxu3 %v2279_v24  ;;  %1481 = vmatpush.bf16.msra.mxu2 %v2415_v32  ;;  %v1089_v24 = vpop.permute.xlu2 %1088 }
  0xcb   : > { %v967_v28 = vpop.f32.mrf.mxu1  ;;  %v1529_v32 = vld [vmem:[%s3379_s11] sm:$0xff] }
  0xcc   : > { %v968_v29 = vadd.f32 %v967_v28, %v946_v27  ;;  %v2473_v27 = vld [vmem:[%s3370_s2 + $0x110] sm:$0xf0]  ;;  %v2283_v28 = vor.u32 %v2450_v23, %v2280_v25  ;;  %v1082_v23 = vpop.permute.xlu1 %1081  ;;  %v1531_v33 = vsel %vm504_vm0, %v1529_v32, 0 }
  0xcd   : > { %v1553_v35 = vand.u32 4294901760, %v1531_v33 }
  0xce   : > { %1074 = vmatmul.f32.vlgmr.msrb.gmra.mxu0 %v968_v29  ;;  %v2367_v29 = vor.u32 %v2473_v27, %v2366_v26  ;;  %1382 = vmatpush.bf16.msrb.mxu3 %v2259_v36 }
  0xcf   : > { %1394 = vmatpush.bf16.msra.mxu0 %v2283_v28  ;;  %1482 = vmatpush.bf16.msra.mxu2 %v2411_v44  ;;  %v1554_v39 = vsub.f32 %v1531_v33, %v1553_v35 }
  0xd0   : > { %1403 = vmatpush.bf16.msra.mxu1 %v2367_v29  ;;  %v1415_v29 = vpack.c.bf16 %v2757_v16, %v2757_v16 }
  0xd1   : > { %v1555_v44 = vand.u32 4294901760, %v1554_v39 }
  0xd2   : > { %1383 = vmatpush.bf16.msrb.mxu3 %v2239_v48 }
  0xd3   : > { %1395 = vmatpush.bf16.msra.mxu0 %v2263_v40  ;;  %1483 = vmatpush.bf16.msra.mxu2 %v2407_v56  ;;  %v1936_v40 = vld [vmem:[%s3380_s12] sm:$0xff]  ;;  %v1556_v45 = vsub.f32 %v1554_v39, %v1555_v44 }
  0xd4   : > { %1404 = vmatpush.bf16.msra.mxu1 %v2347_v41 }
  0xd5   : > { %v1557_v51 = vand.u32 4294901760, %v1556_v45 }
  0xd7   : > { %1396 = vmatpush.bf16.msra.mxu0 %v2243_v52  ;;  %1484 = vmatpush.bf16.msra.mxu2 %v2403_v62 }
  0xd8   : > { %1405 = vmatpush.bf16.msra.mxu1 %v2327_v53 }
  0xdb   : > { %1485 = vmatpush.bf16.msra.mxu2 %v2399_v4 }
  0xdc   : > { %1406 = vmatpush.bf16.msra.mxu1 %v2307_v60 }
  0xdf   : > { %1486 = vmatpush.bf16.msra.mxu2 %v2395_v10 }
  0xe0   : > { %1407 = vmatpush.bf16.msra.mxu1 %v2287_v3 }
  0xe3   : > { %1487 = vmatpush.bf16.msra.mxu2 %v2391_v17  ;;  %v1684_v17 = vsel %vm1682_vm3, %v1519_v12, 0 }
  0xe4   : > { %1408 = vmatpush.bf16.msra.mxu1 %v2267_v9 }
  0xe8   : > { %1409 = vmatpush.bf16.msra.mxu1 %v2247_v15 }
 0x139   : > { %v1035_v19 = vpop.f32.mrf.mxu2 }
 0x145   : > { %v1055_v18 = vpop.f32.mrf.mxu3 }
 0x146   : > { %v1056_v20 = vadd.f32 %v1055_v18, %v1035_v19  ;;  %v3266_v19 = vand.u32 4294901760, %v1684_v17 }
 0x14b   : > { %v1075_v21 = vpop.f32.mrf.mxu0 }
 0x14c   : > { %v1076_v22 = vadd.f32 %v1075_v21, %v1056_v20 }
 0x14e   : > { %v1084_v25 = vmul.f32 %v1082_v23, %v1076_v22 }
 0x150   : > { %v1091_v26 = vadd.f32 %v1089_v24, %v1084_v25 }
 0x152   : > { %v1092_v27 = vmax.f32 %v1091_v26, 0.0  ;;  %v1712_v26 = vsub.f32 %v1684_v17, %v3266_v19 }
 0x154   : > { %v1093_v28 = vpack.c.bf16 %v1092_v27, %v1092_v27 }
 0x156   : > { %1358 = vmatmul.bf16.vlgmr.msrb.gmra.mxu1 %v1093_v28  ;;  %1371 = vmatmul.bf16.vlgmr.msrb.gmra.mxu2 %v1093_v28 }
 0x157   : > { %1384 = vmatmul.bf16.vlgmr.msrb.gmra.mxu3 %v1093_v28  ;;  %1397 = vmatmul.bf16.vlgmr.msra.gmra.mxu0 %v1093_v28 }
 0x166   : > { %1410 = vmatmul.bf16.vlgmr.msra.gmra.mxu1 %v1093_v28  ;;  %1488 = vmatmul.bf16.vlgmr.msra.gmra.mxu2 %v1415_v29 }
 0x1d3   : > { %v1359_v30 = vpop.f32.mrf.mxu1 }
 0x1d4   : > { %1494 = vst.msk [vmem:[#allocation2] sm:$0xff] %vm1493_vm2, %v1359_v30  ;;  %v1398_v31 = vpop.f32.mrf.mxu0 }
 0x1d5   : > { %1512 = vst.msk [vmem:[#allocation2 + $0x30] sm:$0xff] %vm1493_vm2, %v1398_v31  ;;  %1514 = vrot.lane.b32.xlu2 %v1398_v31, %s2600_s25 }
 0x1d9   : > { %v1372_v34 = vpop.f32.mrf.mxu2 }
 0x1da   : > { %1500 = vst.msk [vmem:[#allocation2 + $0x10] sm:$0xff] %vm1493_vm2, %v1372_v34  ;;  %v1385_v16 = vpop.f32.mrf.mxu3  ;;  %1502 = vrot.lane.b32.xlu1 %v1372_v34, %s2600_s25 }
 0x1db   : > { %1506 = vst.msk [vmem:[#allocation2 + $0x20] sm:$0xff] %vm1493_vm2, %v1385_v16  ;;  %1508 = vrot.lane.b32.xlu0 %v1385_v16, %s2600_s25  ;;  %v1361_v36 = vpop.f32.mrf.mxu1  ;;  %v1520_v25 = vld [vmem:[#allocation2] sm:$0xff] }
 0x1dc   : > { %v1400_v37 = vpop.f32.mrf.mxu0  ;;  %v1526_v63 = vld [vmem:[#allocation2 + $0x30] sm:$0xff]  ;;  %v3281_v32 = vand.u32 4294901760, %v1520_v25 }
 0x1dd   : > { %1496 = vrot.lane.b32.xlu2 %v1359_v30, %s2600_s25  ;;  %v3234_v0 = vand.u32 4294901760, %v1526_v63  ;;  %s2156_s25 = scalar_lea.sflag [#allocation5], %s485_s16 }
 0x1df   : > { %v3237_v1 = vsub.f32 %v1526_v63, %v3234_v0 }
 0x1e1   : > { %v1374_v41 = vpop.f32.mrf.mxu2  ;;  %v1741_v6 = vand.u32 4294901760, %v3237_v1  ;;  %v1522_v20 = vld [vmem:[#allocation2 + $0x10] sm:$0xff] }
 0x1e2   : > { %v1387_v42 = vpop.f32.mrf.mxu3  ;;  %1999 = vperm.xlu1 %2533, %v1996_v38   ;;  %v1524_v15 = vld [vmem:[#allocation2 + $0x20] sm:$0xff]  ;;  %v3271_v24 = vand.u32 4294901760, %v1522_v20 }
 0x1e3   : > { %1939 = vperm.xlu0 %2532, %v1936_v40   ;;  %v1411_v43 = vpop.f32.mrf.mxu1  ;;  %v1742_v9 = vsub.f32 %v3237_v1, %v1741_v6  ;;  %v3264_v18 = vand.u32 4294901760, %v1524_v15 }
 0x1e4   : > { %1518 = vst.msk [vmem:[#allocation2 + $0x40] sm:$0xff] %vm1493_vm2, %v1411_v43  ;;  %v1764_v34 = vsub.f32 %v1522_v20, %v3271_v24 }
 0x1e5   : > { %v1743_v11 = vand.u32 4294901760, %v1742_v9  ;;  %v3269_v23 = vsub.f32 %v1524_v15, %v3264_v18 }
 0x1e6   : > { %v1765_v43 = vand.u32 4294901760, %v1764_v34 }
 0x1e7   : > { %v1753_v16 = vand.u32 4294901760, %v3269_v23 }
 0x1e9   : > { %v1489_v46 = vpop.f32.mrf.mxu2  ;;  %v1754_v41 = vsub.f32 %v3269_v23, %v1753_v16 }
 0x1ea   : > { %v1534_v47 = vsel %vm508_vm1, %v1489_v46, 0 }
 0x1eb   : > { %v1551_v48 = vand.u32 4294901760, %v1534_v47  ;;  %v1413_v49 = vpop.f32.mrf.mxu1  ;;  %v1528_v50 = vld [vmem:[#allocation2 + $0x40] sm:$0xff] }
 0x1ec   : > { %v3221_v52 = vand.u32 4294901760, %v1528_v50  ;;  %v1766_v49 = vsub.f32 %v1764_v34, %v1765_v43 }
 0x1ed   : > { %v1578_v53 = vsub.f32 %v1534_v47, %v1551_v48  ;;  %1552 = vmatpush.msra.mxu3 %v1551_v48  ;;  %v1755_v47 = vand.u32 4294901760, %v1754_v41 }
 0x1ee   : > { %1834 = vmatpush.msrb.mxu2 %v3221_v52  ;;  %v3225_v54 = vsub.f32 %v1528_v50, %v3221_v52  ;;  %1558 = vmatmul.f32.vlgmr.msra.gmra.mxu3 %v1557_v51 }
 0x1ef   : > { %1628 = vmatpush.msrb.mxu3 %v1551_v48  ;;  %v1579_v55 = vand.u32 4294901760, %v1578_v53  ;;  %1605 = vmatpush.msrb.mxu1 %v1578_v53 }
 0x1f0   : > { %v1729_v56 = vand.u32 4294901760, %v3225_v54  ;;  %1608 = vmatmul.f32.vlgmr.msrb.gmra.mxu1 %v1554_v39  ;;  %v1776_v39 = vsub.f32 %v1520_v25, %v3281_v32 }
 0x1f1   : > { %1694 = vmatpush.msra.mxu3 %v3221_v52  ;;  %1676 = vmatpush.msra.mxu1 %v1551_v48  ;;  %v1580_v57 = vsub.f32 %v1578_v53, %v1579_v55  ;;  %v1491_v58 = vpop.f32.mrf.mxu2 }
 0x1f2   : > { %v1730_v59 = vsub.f32 %v3225_v54, %v1729_v56  ;;  %v1777_v50 = vand.u32 4294901760, %v1776_v39 }
 0x1f3   : > { %1795 = vmatpush.msrb.mxu1 %v3225_v54  ;;  %v1581_v60 = vand.u32 4294901760, %v1580_v57 }
 0x1f4   : > { %v1731_v61 = vand.u32 4294901760, %v1730_v59  ;;  %v1778_v57 = vsub.f32 %v1776_v39, %v1777_v50 }
 0x1f5   : > { %1582 = vmatpush.msrb.mxu0 %v1581_v60 }
 0x1f6   : > { %1584 = vmatmul.f32.vlgmr.msrb.gmra.mxu0 %v1553_v35  ;;  %1632 = vmatmul.f32.vlgmr.msrb.gmra.mxu3 %v1555_v44  ;;  %v1779_v59 = vand.u32 4294901760, %v1778_v57 }
 0x1f7   : > { %1654 = vmatpush.msra.mxu0 %v1579_v55  ;;  %v1767_v55 = vand.u32 4294901760, %v1766_v49 }
 0x1f8   : > { %1678 = vmatmul.f32.vlgmr.msra.gmra.mxu1 %v1553_v35 }
 0x1f9   : > { %1732 = vmatpush.msrb.mxu0 %v1731_v61 }
 0x1fe   : > { %1656 = vmatmul.f32.vlgmr.msra.gmra.mxu0 %v1553_v35  ;;  %v1713_v35 = vand.u32 4294901760, %v1712_v26 }
 0x200   : > { %v1714_v42 = vsub.f32 %v1712_v26, %v1713_v35 }
 0x202   : > { %v1715_v48 = vand.u32 4294901760, %v1714_v42 }
 0x22f   : > { %v1515_v62 = vpop.permute.xlu2 %1514 }
 0x230   : > { %1517 = vst.msk [vmem:[#allocation2 + $0x38] sm:$0xff] %vm1493_vm2, %v1515_v62  ;;  %v2488_v62 = vld [vmem:[%s3371_s3 + $0x8] sm:$0xff] }
 0x237   : > { %v1497_v2 = vpop.permute.xlu2 %1496  ;;  %v1527_v3 = vld [vmem:[#allocation2 + $0x38] sm:$0xff] }
 0x238   : > { %1499 = vst.msk [vmem:[#allocation2 + $0x8] sm:$0xff] %vm1493_vm2, %v1497_v2  ;;  %v3240_v4 = vand.u32 4294901760, %v1527_v3  ;;  %v2487_v2 = vld [vmem:[%s3371_s3] sm:$0xff] }
 0x23a   : > { %1696 = vmatpush.msra.mxu3 %v3240_v4  ;;  %1836 = vmatpush.msrb.mxu2 %v3240_v4  ;;  %v3245_v5 = vsub.f32 %v1527_v3, %v3240_v4 }
 0x23c   : > { %1698 = vmatpush.msra.mxu3 %v3234_v0  ;;  %1798 = vmatpush.msrb.mxu1 %v3245_v5  ;;  %v1735_v7 = vand.u32 4294901760, %v3245_v5 }
 0x23d   : > { %1838 = vmatpush.msrb.mxu2 %v3234_v0 }
 0x23e   : > { %1801 = vmatpush.msrb.mxu1 %v3237_v1  ;;  %v1736_v8 = vsub.f32 %v3245_v5, %v1735_v7 }
 0x23f   : > { %v1521_v21 = vld [vmem:[#allocation2 + $0x8] sm:$0xff] }
 0x240   : > { %v1737_v10 = vand.u32 4294901760, %v1736_v8  ;;  %v3278_v30 = vand.u32 4294901760, %v1521_v21 }
 0x242   : > { %1738 = vmatpush.msrb.mxu0 %v1737_v10  ;;  %v1770_v37 = vsub.f32 %v1521_v21, %v3278_v30 }
 0x244   : > { %1744 = vmatpush.msrb.mxu0 %v1743_v11  ;;  %v1771_v46 = vand.u32 4294901760, %v1770_v37 }
 0x246   : > { %v1772_v53 = vsub.f32 %v1770_v37, %v1771_v46 }
 0x248   : > { %v1773_v58 = vand.u32 4294901760, %v1772_v53 }
 0x24c   : > { %v1503_v13 = vpop.permute.xlu1 %1502 }
 0x24d   : > { %v1509_v14 = vpop.permute.xlu0 %1508  ;;  %1505 = vst.msk [vmem:[#allocation2 + $0x18] sm:$0xff] %vm1493_vm2, %v1503_v13 }
 0x24e   : > { %1511 = vst.msk [vmem:[#allocation2 + $0x28] sm:$0xff] %vm1493_vm2, %v1509_v14 }
 0x254   : > { %v1523_v22 = vld [vmem:[#allocation2 + $0x18] sm:$0xff] }
 0x255   : > { %v1525_v27 = vld [vmem:[#allocation2 + $0x28] sm:$0xff]  ;;  %v3274_v28 = vand.u32 4294901760, %v1523_v22  ;;  %v1940_v21 = vpop.permute.xlu0 %1939 }
 0x256   : > { %v3276_v29 = vand.u32 4294901760, %v1525_v27 }
 0x257   : > { %v1758_v31 = vsub.f32 %v1523_v22, %v3274_v28 }
 0x258   : > { %1700 = vmatpush.msra.mxu3 %v3276_v29  ;;  %1840 = vmatpush.msrb.mxu2 %v3276_v29  ;;  %v1746_v33 = vsub.f32 %v1525_v27, %v3276_v29 }
 0x259   : > { %v1759_v38 = vand.u32 4294901760, %v1758_v31 }
 0x25a   : > { %1702 = vmatpush.msra.mxu3 %v3264_v18  ;;  %1804 = vmatpush.msrb.mxu1 %v1746_v33  ;;  %v1747_v36 = vand.u32 4294901760, %v1746_v33 }
 0x25b   : > { %1842 = vmatpush.msrb.mxu2 %v3264_v18  ;;  %v1760_v45 = vsub.f32 %v1758_v31, %v1759_v38 }
 0x25c   : > { %1704 = vmatpush.msra.mxu3 %v3274_v28  ;;  %1807 = vmatpush.msrb.mxu1 %v3269_v23  ;;  %v1748_v40 = vsub.f32 %v1746_v33, %v1747_v36 }
 0x25d   : > { %1844 = vmatpush.msrb.mxu2 %v3274_v28  ;;  %v1761_v51 = vand.u32 4294901760, %v1760_v45 }
 0x25e   : > { %1706 = vmatpush.msra.mxu3 %v3271_v24  ;;  %1810 = vmatpush.msrb.mxu1 %v1758_v31  ;;  %v1749_v44 = vand.u32 4294901760, %v1748_v40  ;;  %v2000_v40 = vpop.permute.xlu1 %1999 }
 0x25f   : > { %1846 = vmatpush.msrb.mxu2 %v3271_v24  ;;  %v2002_v41 = vperm.slane %v2000_v40, 0 }
 0x260   : > { %1708 = vmatpush.msra.mxu3 %v3278_v30  ;;  %1750 = vmatpush.msrb.mxu0 %v1749_v44 }
 0x261   : > { %1813 = vmatpush.msrb.mxu1 %v1764_v34  ;;  %1848 = vmatpush.msrb.mxu2 %v3278_v30 }
 0x262   : > { %1710 = vmatpush.msra.mxu3 %v3281_v32  ;;  %1756 = vmatpush.msrb.mxu0 %v1755_v47 }
 0x263   : > { %1816 = vmatpush.msrb.mxu1 %v1770_v37  ;;  %1850 = vmatpush.msrb.mxu2 %v3281_v32 }
 0x264   : > { %1716 = vmatmul.f32.vlgmr.msra.gmra.mxu3 %v1715_v48  ;;  %1762 = vmatpush.msrb.mxu0 %v1761_v51 }
 0x265   : > { %1868 = vmatpush.msrb.mxu3 %v1729_v56  ;;  %1819 = vmatpush.msrb.mxu1 %v1776_v39  ;;  %v2489_v56 = vld [vmem:[%s3371_s3 + $0x10] sm:$0xff] }
 0x266   : > { %1768 = vmatpush.msrb.mxu0 %v1767_v55  ;;  %1854 = vmatmul.f32.vlgmr.msrb.gmra.mxu2 %v1713_v35 }
 0x267   : > { %1872 = vmatpush.msrb.mxu3 %v1735_v7  ;;  %1822 = vmatmul.f32.vlgmr.msrb.gmra.mxu1 %v1712_v26  ;;  %v1995_v26 = vld [vmem:[%s3381_s13] sm:$0x1] }
 0x268   : > { %1774 = vmatpush.msrb.mxu0 %v1773_v58  ;;  %v2005_v27 = vsel %vm2003_vm5, %v1995_v26, 0 }
 0x269   : > { %1876 = vmatpush.msrb.mxu3 %v1741_v6 }
 0x26a   : > { %1780 = vmatpush.msrb.mxu0 %v1779_v59 }
 0x26b   : > { %1880 = vmatpush.msrb.mxu3 %v1747_v36  ;;  %1782 = vmatmul.f32.vlgmr.msrb.gmra.mxu0 %v3266_v19 }
 0x26c   : > { %1914 = vmatpush.msra.mxu0 %v3221_v52  ;;  %v2490_v52 = vld [vmem:[%s3371_s3 + $0x18] sm:$0xff] }
 0x26d   : > { %1884 = vmatpush.msrb.mxu3 %v1753_v16  ;;  %1986 = vmatpush.bf16.msra.mxu1 %v2490_v52  ;;  %v1609_v63 = vpop.f32.mrf.mxu1 }
 0x26e   : > { %1916 = vmatpush.msra.mxu0 %v3240_v4 }
 0x26f   : > { %1888 = vmatpush.msrb.mxu3 %v1759_v38 }
 0x270   : > { %1918 = vmatpush.msra.mxu0 %v3234_v0 }
 0x271   : > { %1892 = vmatpush.msrb.mxu3 %v1765_v43  ;;  %v1559_v54 = vpop.f32.mrf.mxu3  ;;  %1987 = vmatpush.bf16.msra.mxu1 %v2489_v56 }
 0x272   : > { %1920 = vmatpush.msra.mxu0 %v3276_v29 }
 0x273   : > { %1896 = vmatpush.msrb.mxu3 %v1771_v46  ;;  %v1585_v60 = vpop.f32.mrf.mxu0 }
 0x274   : > { %1922 = vmatpush.msra.mxu0 %v3264_v18  ;;  %v1586_v61 = vadd.f32 %v1585_v60, %v1559_v54 }
 0x275   : > { %1900 = vmatpush.msrb.mxu3 %v1777_v50  ;;  %1988 = vmatpush.bf16.msra.mxu1 %v2488_v62  ;;  %v1679_v6 = vpop.f32.mrf.mxu1 }
 0x276   : > { %1902 = vmatmul.f32.vlgmr.msrb.gmra.mxu3 %v3266_v19  ;;  %1924 = vmatpush.msra.mxu0 %v3274_v28  ;;  %v1610_v0 = vadd.f32 %v1609_v63, %v1586_v61  ;;  %v2024_v28 = vand.u32 4294901760, %v2005_v27 }
 0x278   : > { %1926 = vmatpush.msra.mxu0 %v3271_v24  ;;  %v2025_v29 = vsub.f32 %v2005_v27, %v2024_v28 }
 0x279   : > { %v1633_v1 = vpop.f32.mrf.mxu3  ;;  %1989 = vmatpush.bf16.msra.mxu1 %v2487_v2 }
 0x27a   : > { %1928 = vmatpush.msra.mxu0 %v3278_v30  ;;  %v1634_v3 = vadd.f32 %v1633_v1, %v1610_v0  ;;  %v2026_v30 = vand.u32 4294901760, %v2025_v29 }
 0x27b   : > { %v1657_v4 = vpop.f32.mrf.mxu0 }
 0x27c   : > { %1930 = vmatpush.msra.mxu0 %v3281_v32  ;;  %v1658_v5 = vadd.f32 %v1657_v4, %v1634_v3  ;;  %v2027_v31 = vsub.f32 %v2025_v29, %v2026_v30 }
 0x27d   : > { %1932 = vmatmul.f32.vlgmr.msra.gmra.mxu0 %v3266_v19 }
 0x27e   : > { %v1680_v8 = vadd.f32 %v1679_v6, %v1658_v5  ;;  %v2028_v33 = vand.u32 4294901760, %v2027_v31 }
 0x2e4   : > { %v1823_v12 = vpop.f32.mrf.mxu1 }
 0x2e7   : > { %v1717_v7 = vpop.f32.mrf.mxu3 }
 0x2e8   : > { %v1718_v9 = vadd.f32 %v1717_v7, %v1680_v8  ;;  %v1783_v10 = vpop.f32.mrf.mxu0 }
 0x2e9   : > { %v1855_v14 = vpop.f32.mrf.mxu2 }
 0x2ea   : > { %v1784_v11 = vadd.f32 %v1783_v10, %v1718_v9 }
 0x2ec   : > { %v1824_v13 = vadd.f32 %v1823_v12, %v1784_v11 }
 0x2ee   : > { %v1856_v15 = vadd.f32 %v1855_v14, %v1824_v13 }
 0x2f9   : > { %v1903_v17 = vpop.f32.mrf.mxu3 }
 0x2fa   : > { %v1904_v18 = vadd.f32 %v1903_v17, %v1856_v15  ;;  %v1933_v19 = vpop.f32.mrf.mxu0 }
 0x2fc   : > { %v1934_v20 = vadd.f32 %v1933_v19, %v1904_v18 }
 0x2fe   : > { %v1942_v22 = vadd.f32 %v1940_v21, %v1934_v20 }
 0x300   : > { %vm1943_vm4 = vcmp.ge.f32.partialorder %v1942_v22, 0.0  ;;  %v1944_v23 = vmul.f32 0.2, %v1942_v22 }
 0x302   : > { %v1945_v24 = vsel %vm1943_vm4, %v1942_v22, %v1944_v23 }
 0x303   : > { %v1946_v25 = vpack.c.bf16 %v1945_v24, %v1945_v24 }
 0x305   : > { %2436 = vmatmul.msk.bf16.vlgmr.msra.gmra.mxu1 %vm1493_vm2, %v1946_v25 }
 0x382   : > { %v1991_v32 = vpop.f32.mrf.mxu1 }
 0x383   : > { %v2022_v34 = vand.u32 4294901760, %v1991_v32 }
 0x385   : > { %v2049_v16 = vsub.f32 %v1991_v32, %v2022_v34  ;;  %2023 = vmatpush.msra.mxu2 %v2022_v34 }
 0x386   : > { %2029 = vmatmul.f32.vlgmr.msra.gmra.mxu2 %v2028_v33 }
 0x387   : > { %v2050_v35 = vand.u32 4294901760, %v2049_v16  ;;  %2076 = vmatpush.msra.mxu3 %v2049_v16 }
 0x388   : > { %2079 = vmatmul.f32.vlgmr.msra.gmra.mxu3 %v2025_v29 }
 0x389   : > { %2147 = vmatpush.msrb.mxu3 %v2022_v34  ;;  %v2051_v36 = vsub.f32 %v2049_v16, %v2050_v35  ;;  %2125 = vmatpush.msrb.mxu0 %v2050_v35 }
 0x38a   : > { %v1993_v37 = vpop.f32.mrf.mxu1  ;;  %2127 = vmatmul.f32.vlgmr.msrb.gmra.mxu0 %v2024_v28 }
 0x38b   : > { %v2052_v38 = vand.u32 4294901760, %v2051_v36 }
 0x38d   : > { %2053 = vmatpush.msrb.mxu2 %v2052_v38 }
 0x38e   : > { %2055 = vmatmul.f32.vlgmr.msrb.gmra.mxu2 %v2024_v28 }
 0x38f   : > { %2099 = vmatpush.msra.mxu2 %v2022_v34 }
 0x390   : > { %2149 = vmatmul.f32.vlgmr.msrb.gmra.mxu3 %v2024_v28 }
 0x396   : > { %2103 = vmatmul.f32.vlgmr.msra.gmra.mxu2 %v2026_v30 }
 0x407   : > { %v2128_v48 = vpop.f32.mrf.mxu0 }
 0x409   : > { %v2030_v39 = vpop.f32.mrf.mxu2 }
 0x40a   : > { %v2031_v43 = vadd.f32 %v2030_v39, %v2002_v41 }
 0x40b   : > { %v2080_v44 = vpop.f32.mrf.mxu3 }
 0x411   : > { %v2056_v42 = vpop.f32.mrf.mxu2 }
 0x412   : > { %v2057_v45 = vadd.f32 %v2056_v42, %v2031_v43 }
 0x413   : > { %v2150_v50 = vpop.f32.mrf.mxu3 }
 0x414   : > { %v2081_v46 = vadd.f32 %v2080_v44, %v2057_v45 }
 0x419   : > { %v2104_v47 = vpop.f32.mrf.mxu2 }
 0x41a   : > { %v2105_v49 = vadd.f32 %v2104_v47, %v2081_v46 }
 0x41c   : > { %v2129_v51 = vadd.f32 %v2128_v48, %v2105_v49 }
 0x41e   : > { %v2151_v53 = vadd.f32 %v2150_v50, %v2129_v51 }
 0x420   : > { %2154 = vst.msk [vmem:[%s486_s26] sm:$0x1] %vm2153_vm6, %v2151_v53 }
 0x421   : > { %2562 = shalt.err (!%p2559_p3)
}
 0x422   : > { %2491 = dma.vmem_to_hbm [thread:$0]  (%p2722_p5), %s2167_s24, 16, %s2169_s22, %s2156_s25  }
 0x423 PF: > { %p2497_p4 = scmp.ge.s32.totalorder %s2597_s23, 2  ;;  %s2180_s26 = sand.u32 1, %s2585_s20  }
 0x424   : > { %s2181_s14 = scalar_lea.sflag [#allocation5], %s2180_s26 }
 0x425   : > { %p2494_p7 = pnand %p2497_p4, %p2726_p6 }
 0x427   : > { %p2495_p8 = pneg %p2494_p7 }
 0x429   : > { %2580 = dma.done.wait (%p2495_p8), %s2181_s14, 16  }
 0x42a   : > { %2582 = vsyncadd (%p2495_p8), %s2181_s14, 4294967280  ;;  %s3395_s23 = sld [smem:[#allocation8_spill]]  ;;  %s3398_s20 = smov %s2589_s21 }
 0x42b   : > { %s3396_s28 = sld [smem:[#allocation7_spill]] }
 0x42c   : > { %s3397_s22 = sld [smem:[#allocation9_spill]] }
 0x430   : > { %p27_p9 = scmp.ge.s32.totalorder %s3395_s23, 4  }
 0x431   : > { %s3399_s21 = smov %s3396_s28 }
 0x432   :  { %29 = sbr.rel (!%p27_p9) target bundleno = 6 (0x6), region = 115 }
 0x437   :  { %2186 = vsyncpa [#allocation5], 1 }
 0x438   :  { %2188 = vsyncpa [#allocation5 + $0x1], 1 }

</bundles_post_ra>
